<compile_context>
chip_gen: v7x
topology: tpu7x:2x2x1
jax: 0.10.0
libtpu: 0.0.40
codegen_flags: <defaults>
</compile_context>

<pallas_src>
import functools

import numpy as np
import jax
import jax.numpy as jnp
from jax import lax
from jax.experimental import pallas as pl
from jax.experimental.pallas import tpu as pltpu


# ----------------------------------------------------------------------------
# Layer configuration mirroring the PyTorch module
#   encoder: Conv(1->16,s2,p1)+ReLU, Conv(16->16,s2,p1)+ReLU, Conv(16->16,s2,p1)
#   decoder: ConvT(16->16,s2,p1)+ReLU, ConvT(16->16,s2,p1)+ReLU,
#            ConvT(16->1,s2,p0,op1)+Sigmoid
# ----------------------------------------------------------------------------
_LAYERS = (
    # (kind,   name, stride, pad, out_pad, activation)
    ("conv",  "e0", 2, 1, 0, "relu"),
    ("conv",  "e1", 2, 1, 0, "relu"),
    ("conv",  "e2", 2, 1, 0, "none"),
    ("convt", "d0", 2, 1, 0, "relu"),
    ("convt", "d1", 2, 1, 0, "relu"),
    ("convt", "d2", 2, 0, 1, "sigmoid"),
)


def _round_up(x, m):
    return ((x + m - 1) // m) * m


# ----------------------------------------------------------------------------
# Parameter init (deterministic, PyTorch-style uniform(-1/sqrt(fan_in), ...))
# ----------------------------------------------------------------------------
def _init_conv(key, cout, cin, k):
    kw, kb = jax.random.split(key)
    bound = 1.0 / float(np.sqrt(cin * k * k))
    w = jax.random.uniform(kw, (cout, cin, k, k), jnp.float32, -bound, bound)
    b = jax.random.uniform(kb, (cout,), jnp.float32, -bound, bound)
    return w, b


def _init_convt(key, cin, cout, k):
    kw, kb = jax.random.split(key)
    bound = 1.0 / float(np.sqrt(cout * k * k))
    w = jax.random.uniform(kw, (cin, cout, k, k), jnp.float32, -bound, bound)
    b = jax.random.uniform(kb, (cout,), jnp.float32, -bound, bound)
    return w, b


def init_params(key):
    keys = jax.random.split(key, 6)
    p = {}
    p["e0_w"], p["e0_b"] = _init_conv(keys[0], 16, 1, 3)
    p["e1_w"], p["e1_b"] = _init_conv(keys[1], 16, 16, 3)
    p["e2_w"], p["e2_b"] = _init_conv(keys[2], 16, 16, 3)
    p["d0_w"], p["d0_b"] = _init_convt(keys[3], 16, 16, 3)
    p["d1_w"], p["d1_b"] = _init_convt(keys[4], 16, 16, 3)
    p["d2_w"], p["d2_b"] = _init_convt(keys[5], 16, 1, 3)
    return p


# ----------------------------------------------------------------------------
# One-time (setup) weight transformation: conv / conv-transpose -> dense
# operator over channel-minor flattened per-image activations.
#   feature index = (h * W + w) * C + c
# NOTE: this dense path inflates FLOPs/weights (A is mostly zeros) and grows
# as (H*W*C)^2 per layer; it is only appropriate for small spatial dims where
# the problem is launch/HBM-bound.  For large images use a tiled
# shifted-window conv kernel instead (the batch-tiled grid already supports
# swapping the body).
# ----------------------------------------------------------------------------
def _conv_dense_operator(w, b, H, W, stride, pad):
    # w: PyTorch Conv2d layout (Cout, Cin, k, k)
    Cout, Cin, k, _ = w.shape
    OH = (H + 2 * pad - k) // stride + 1
    OW = (W + 2 * pad - k) // stride + 1
    A = np.zeros((H * W * Cin, OH * OW * Cout), np.float32)
    for oh in range(OH):
        for ow in range(OW):
            o0 = (oh * OW + ow) * Cout
            for dy in range(k):
                ih = oh * stride + dy - pad
                if ih < 0 or ih >= H:
                    continue
                for dx in range(k):
                    iw = ow * stride + dx - pad
                    if iw < 0 or iw >= W:
                        continue
                    i0 = (ih * W + iw) * Cin
                    A[i0:i0 + Cin, o0:o0 + Cout] += w[:, :, dy, dx].T
    bias = np.tile(b.astype(np.float32), OH * OW).reshape(1, OH * OW * Cout)
    return A, bias, OH, OW, Cout


def _convt_dense_operator(w, b, H, W, stride, pad, out_pad):
    # w: PyTorch ConvTranspose2d layout (Cin, Cout, k, k)
    Cin, Cout, k, _ = w.shape
    OH = (H - 1) * stride - 2 * pad + k + out_pad
    OW = (W - 1) * stride - 2 * pad + k + out_pad
    A = np.zeros((H * W * Cin, OH * OW * Cout), np.float32)
    for ih in range(H):
        for iw in range(W):
            i0 = (ih * W + iw) * Cin
            for dy in range(k):
                oh = ih * stride + dy - pad
                if oh < 0 or oh >= OH:
                    continue
                for dx in range(k):
                    ow = iw * stride + dx - pad
                    if ow < 0 or ow >= OW:
                        continue
                    o0 = (oh * OW + ow) * Cout
                    A[i0:i0 + Cin, o0:o0 + Cout] += w[:, :, dy, dx]
    bias = np.tile(b.astype(np.float32), OH * OW).reshape(1, OH * OW * Cout)
    return A, bias, OH, OW, Cout


# ----------------------------------------------------------------------------
# Fused Pallas kernel: 5 x (bf16 matmul + f32 bias + activation), all in VMEM.
# ----------------------------------------------------------------------------
def _fused_forward_kernel(x_ref, *refs, acts):
    """refs = (A_0, b_0, ..., A_{L-1}, b_{L-1}, out_ref); all VMEM-resident."""
    out_ref = refs[-1]
    h = x_ref[...]                                       # (TB, F_in_padded) f32
    for layer, act in enumerate(acts):
        a = refs[2 * layer][...]                         # (F_in_p, F_out_p) bf16
        b = refs[2 * layer + 1][...]                     # (1, F_out_p)      f32
        h = jnp.dot(h.astype(a.dtype), a,
                    preferred_element_type=jnp.float32) + b
        if act == "relu":
            h = jnp.maximum(h, 0.0)
        elif act == "sigmoid":
            h = jax.nn.sigmoid(h)
    out_ref[...] = h.astype(out_ref.dtype)


def make_forward(params, N, H, W, C_in=1):
    """Build a jitted forward(x_nchw) specialized to shape (N, C_in, H, W)."""
    # --- 1. per-layer exact dense operators (f32 numpy) ----------------------
    raw = []
    h, w, c = H, W, C_in
    for kind, name, s, p, op, act in _LAYERS:
        wt = np.asarray(params[name + "_w"], np.float32)
        bs = np.asarray(params[name + "_b"], np.float32)
        if kind == "conv":
            A, bflat, h, w, c = _conv_dense_operator(wt, bs, h, w, s, p)
        else:
            A, bflat, h, w, c = _convt_dense_operator(wt, bs, h, w, s, p, op)
        raw.append([A, bflat, act])
    out_h, out_w, out_c = h, w, c

    # --- 2. fuse activation-free adjacent pairs (e2 -> d0) -------------------
    fused = []
    i = 0
    while i < len(raw):
        A, bflat, act = raw[i]
        while act == "none" and i + 1 < len(raw):
            A2, b2, act2 = raw[i + 1]
            A = A @ A2                       # exact: no nonlinearity between
            bflat = bflat @ A2 + b2
            act = act2
            i += 1
        fused.append((A, bflat, act))
        i += 1

    # --- 3. zero-pad feature dims to multiples of 128 (exact) ----------------
    in_feats = H * W * C_in
    in_feats_p = _round_up(in_feats, 128)
    out_feats = out_h * out_w * out_c
    mats, biases, acts = [], [], []
    prev_p = in_feats_p
    for A, bflat, act in fused:
        fi, fo = A.shape
        fo_p = _round_up(fo, 128)
        Ap = np.zeros((prev_p, fo_p), np.float32)
        Ap[:fi, :fo] = A
        bp = np.zeros((1, fo_p), np.float32)
        bp[:, :fo] = bflat
        mats.append(jnp.asarray(Ap, jnp.bfloat16))   # bf16 operators (MXU-native)
        biases.append(jnp.asarray(bp, jnp.float32))  # biases stay f32 (tiny)
        acts.append(act)
        prev_p = fo_p
    out_feats_p = prev_p

    # Guard the dense-linearization regime (see module comment).
    if max([in_feats_p] + [a.shape[1] for a in mats]) > 8192:
        raise ValueError(
            "dense-operator path is only for small spatial dims; use a tiled "
            "shifted-window conv kernel for larger images")

    # --- 4. batch-row tiling --------------------------------------------------
    # Tiny batches: one full block.  Larger batches: <=256-row tiles (fills the
    # v6e/v7x MXU M dim, fine for v5e) while keeping >=2 grid steps so both
    # v7x TensorCores get work.  No host-side batch padding: Pallas masks the
    # partial boundary block.
    if N <= 16:
        tb = N
    else:
        tb = min(256, _round_up((N + 1) // 2, 8))
    grid = (pl.cdiv(N, tb),)

    in_specs = [pl.BlockSpec((tb, in_feats_p), lambda i: (i, 0))]
    flat_params = []
    for A, bflat in zip(mats, biases):
        # Constant index_map keeps operators VMEM-resident across grid steps.
        in_specs.append(pl.BlockSpec(A.shape, lambda i: (0, 0)))
        in_specs.append(pl.BlockSpec(bflat.shape, lambda i: (0, 0)))
        flat_params.extend((A, bflat))
    out_specs = pl.BlockSpec((tb, out_feats_p), lambda i: (i, 0))

    fused_call = pl.pallas_call(
        functools.partial(_fused_forward_kernel, acts=tuple(acts)),
        out_shape=jax.ShapeDtypeStruct((N, out_feats_p), jnp.float32),
        grid=grid,
        in_specs=in_specs,
        out_specs=out_specs,
        compiler_params=pltpu.CompilerParams(
            dimension_semantics=("parallel",)),
    )

    @jax.jit
    def forward(x_nchw):
        # Single boundary relayout: NCHW -> channel-minor flat rows (N, H*W*C).
        x = jnp.transpose(x_nchw, (0, 2, 3, 1)).reshape(N, in_feats)
        if in_feats_p != in_feats:       # no-op for 16x16x1 (256 already aligned)
            x = jnp.pad(x, ((0, 0), (0, in_feats_p - in_feats)))
        y = fused_call(x, *flat_params)
        y = y[:, :out_feats].reshape(N, out_h, out_w, out_c)
        return jnp.transpose(y, (0, 3, 1, 2))            # back to NCHW

    return forward


# ----------------------------------------------------------------------------
# Pure-JAX reference (XLA convolutions) for correctness verification.
# ----------------------------------------------------------------------------
def _reference_forward(x_nchw, params):
    x = jnp.transpose(x_nchw, (0, 2, 3, 1))              # NHWC
    dn = ("NHWC", "HWIO", "NHWC")
    for kind, name, s, p, op, act in _LAYERS:
        wt = params[name + "_w"]
        bs = params[name + "_b"]
        if kind == "conv":                               # (Cout, Cin, k, k)
            rhs = jnp.transpose(wt, (2, 3, 1, 0))
            x = lax.conv_general_dilated(
                x, rhs, window_strides=(s, s), padding=[(p, p), (p, p)],
                dimension_numbers=dn)
        else:                                            # (Cin, Cout, k, k)
            k = wt.shape[2]
            rhs = jnp.transpose(jnp.flip(wt, (2, 3)), (2, 3, 0, 1))
            pad = (k - 1 - p, k - 1 - p + op)
            x = lax.conv_general_dilated(
                x, rhs, window_strides=(1, 1), padding=[pad, pad],
                lhs_dilation=(s, s), dimension_numbers=dn)
        x = x + bs.reshape(1, 1, 1, -1)
        if act == "relu":
            x = jnp.maximum(x, 0.0)
        elif act == "sigmoid":
            x = jax.nn.sigmoid(x)
    return jnp.transpose(x, (0, 3, 1, 2))


if __name__ == "__main__":
    key = jax.random.PRNGKey(0)
    k_params, k_x = jax.random.split(key)
    params = init_params(k_params)

    # small deterministic input: batch=2, channels=1, spatial=16x16 (NCHW)
    N, C, H, W = 2, 1, 16, 16
    x = jax.random.uniform(k_x, (N, C, H, W), jnp.float32)

    forward = make_forward(params, N, H, W, C)
    out = jax.block_until_ready(forward(x))

    # shape trace for 16x16 input: enc 8->4->2, dec 3->5->12 (matches PyTorch)
    assert out.shape == (N, 1, 12, 12), out.shape
    assert bool(jnp.all((out >= 0.0) & (out <= 1.0)))    # sigmoid range

    ref = jax.block_until_ready(_reference_forward(x, params))
    max_err = float(jnp.max(jnp.abs(out - ref)))
    # bf16 operators with f32 accumulation: tolerance relaxed vs the f32 build.
    assert bool(jnp.allclose(out, ref, atol=2e-2, rtol=2e-2)), max_err

    print("KERNEL_OK")
</pallas_src>

<mosaic_0001>
module attributes {stable_mosaic.version = 11 : i64} {
  func.func @_fused_forward_kernel(%arg0: i32, %arg1: memref<2x256xf32, #tpu.memory_space<vmem>>, %arg2: memref<256x1024xbf16, #tpu.memory_space<vmem>>, %arg3: memref<1x1024xf32, #tpu.memory_space<vmem>>, %arg4: memref<1024x256xbf16, #tpu.memory_space<vmem>>, %arg5: memref<1x256xf32, #tpu.memory_space<vmem>>, %arg6: memref<256x256xbf16, #tpu.memory_space<vmem>>, %arg7: memref<1x256xf32, #tpu.memory_space<vmem>>, %arg8: memref<256x512xbf16, #tpu.memory_space<vmem>>, %arg9: memref<1x512xf32, #tpu.memory_space<vmem>>, %arg10: memref<512x256xbf16, #tpu.memory_space<vmem>>, %arg11: memref<1x256xf32, #tpu.memory_space<vmem>>, %arg12: memref<2x256xf32, #tpu.memory_space<vmem>>) attributes {dimension_semantics = [#tpu.dimension_semantics<parallel>], iteration_bounds = array<i64: 1>, scalar_prefetch = 0 : i64, scratch_operands = 0 : i64, tpu.core_type = #tpu.core_type<tc>, window_params = [{transform_indices = @transform_0, window_bounds = array<i64: 2, 256>}, {pipeline_mode = #tpu.pipeline_mode<synchronous>, transform_indices = @transform_1, window_bounds = array<i64: 256, 1024>}, {pipeline_mode = #tpu.pipeline_mode<synchronous>, transform_indices = @transform_2, window_bounds = array<i64: 1, 1024>}, {pipeline_mode = #tpu.pipeline_mode<synchronous>, transform_indices = @transform_3, window_bounds = array<i64: 1024, 256>}, {pipeline_mode = #tpu.pipeline_mode<synchronous>, transform_indices = @transform_4, window_bounds = array<i64: 1, 256>}, {pipeline_mode = #tpu.pipeline_mode<synchronous>, transform_indices = @transform_5, window_bounds = array<i64: 256, 256>}, {pipeline_mode = #tpu.pipeline_mode<synchronous>, transform_indices = @transform_6, window_bounds = array<i64: 1, 256>}, {pipeline_mode = #tpu.pipeline_mode<synchronous>, transform_indices = @transform_7, window_bounds = array<i64: 256, 512>}, {pipeline_mode = #tpu.pipeline_mode<synchronous>, transform_indices = @transform_8, window_bounds = array<i64: 1, 512>}, {pipeline_mode = #tpu.pipeline_mode<synchronous>, transform_indices = @transform_9, window_bounds = array<i64: 512, 256>}, {pipeline_mode = #tpu.pipeline_mode<synchronous>, transform_indices = @transform_10, window_bounds = array<i64: 1, 256>}, {transform_indices = @transform_11, window_bounds = array<i64: 2, 256>}]} {
    %c0 = arith.constant 0 : index
    %c0_0 = arith.constant 0 : index
    %0 = vector.load %arg1[%c0, %c0_0] : memref<2x256xf32, #tpu.memory_space<vmem>>, vector<2x256xf32>
    %c0_1 = arith.constant 0 : index
    %c0_2 = arith.constant 0 : index
    %1 = vector.load %arg2[%c0_1, %c0_2] : memref<256x1024xbf16, #tpu.memory_space<vmem>>, vector<256x1024xbf16>
    %c0_3 = arith.constant 0 : index
    %c0_4 = arith.constant 0 : index
    %2 = vector.load %arg3[%c0_3, %c0_4] : memref<1x1024xf32, #tpu.memory_space<vmem>>, vector<1x1024xf32>
    %3 = arith.truncf %0 : vector<2x256xf32> to vector<2x256xbf16>
    %cst = arith.constant dense<0.000000e+00> : vector<2x1024xf32>
    %4 = tpu.matmul %3, %1, %cst {dimension_numbers = #tpu.dot_dimension_numbers<[1], [0], [0], [1], [0, 0, 1, 1], [], []>} : vector<2x256xbf16>, vector<256x1024xbf16>, vector<2x1024xf32> -> vector<2x1024xf32>
    %5 = vector.broadcast %2 : vector<1x1024xf32> to vector<2x1024xf32>
    %6 = arith.addf %4, %5 : vector<2x1024xf32>
    %cst_5 = arith.constant 0.000000e+00 : f32
    %7 = vector.broadcast %cst_5 : f32 to vector<2x1024xf32>
    %8 = arith.maximumf %6, %7 : vector<2x1024xf32>
    %c0_6 = arith.constant 0 : index
    %c0_7 = arith.constant 0 : index
    %9 = vector.load %arg4[%c0_6, %c0_7] : memref<1024x256xbf16, #tpu.memory_space<vmem>>, vector<1024x256xbf16>
    %c0_8 = arith.constant 0 : index
    %c0_9 = arith.constant 0 : index
    %10 = vector.load %arg5[%c0_8, %c0_9] : memref<1x256xf32, #tpu.memory_space<vmem>>, vector<1x256xf32>
    %11 = arith.truncf %8 : vector<2x1024xf32> to vector<2x1024xbf16>
    %cst_10 = arith.constant dense<0.000000e+00> : vector<2x256xf32>
    %12 = tpu.matmul %11, %9, %cst_10 {dimension_numbers = #tpu.dot_dimension_numbers<[1], [0], [0], [1], [0, 0, 1, 1], [], []>} : vector<2x1024xbf16>, vector<1024x256xbf16>, vector<2x256xf32> -> vector<2x256xf32>
    %13 = vector.broadcast %10 : vector<1x256xf32> to vector<2x256xf32>
    %14 = arith.addf %12, %13 : vector<2x256xf32>
    %cst_11 = arith.constant 0.000000e+00 : f32
    %15 = vector.broadcast %cst_11 : f32 to vector<2x256xf32>
    %16 = arith.maximumf %14, %15 : vector<2x256xf32>
    %c0_12 = arith.constant 0 : index
    %c0_13 = arith.constant 0 : index
    %17 = vector.load %arg6[%c0_12, %c0_13] : memref<256x256xbf16, #tpu.memory_space<vmem>>, vector<256x256xbf16>
    %c0_14 = arith.constant 0 : index
    %c0_15 = arith.constant 0 : index
    %18 = vector.load %arg7[%c0_14, %c0_15] : memref<1x256xf32, #tpu.memory_space<vmem>>, vector<1x256xf32>
    %19 = arith.truncf %16 : vector<2x256xf32> to vector<2x256xbf16>
    %cst_16 = arith.constant dense<0.000000e+00> : vector<2x256xf32>
    %20 = tpu.matmul %19, %17, %cst_16 {dimension_numbers = #tpu.dot_dimension_numbers<[1], [0], [0], [1], [0, 0, 1, 1], [], []>} : vector<2x256xbf16>, vector<256x256xbf16>, vector<2x256xf32> -> vector<2x256xf32>
    %21 = vector.broadcast %18 : vector<1x256xf32> to vector<2x256xf32>
    %22 = arith.addf %20, %21 : vector<2x256xf32>
    %cst_17 = arith.constant 0.000000e+00 : f32
    %23 = vector.broadcast %cst_17 : f32 to vector<2x256xf32>
    %24 = arith.maximumf %22, %23 : vector<2x256xf32>
    %c0_18 = arith.constant 0 : index
    %c0_19 = arith.constant 0 : index
    %25 = vector.load %arg8[%c0_18, %c0_19] : memref<256x512xbf16, #tpu.memory_space<vmem>>, vector<256x512xbf16>
    %c0_20 = arith.constant 0 : index
    %c0_21 = arith.constant 0 : index
    %26 = vector.load %arg9[%c0_20, %c0_21] : memref<1x512xf32, #tpu.memory_space<vmem>>, vector<1x512xf32>
    %27 = arith.truncf %24 : vector<2x256xf32> to vector<2x256xbf16>
    %cst_22 = arith.constant dense<0.000000e+00> : vector<2x512xf32>
    %28 = tpu.matmul %27, %25, %cst_22 {dimension_numbers = #tpu.dot_dimension_numbers<[1], [0], [0], [1], [0, 0, 1, 1], [], []>} : vector<2x256xbf16>, vector<256x512xbf16>, vector<2x512xf32> -> vector<2x512xf32>
    %29 = vector.broadcast %26 : vector<1x512xf32> to vector<2x512xf32>
    %30 = arith.addf %28, %29 : vector<2x512xf32>
    %cst_23 = arith.constant 0.000000e+00 : f32
    %31 = vector.broadcast %cst_23 : f32 to vector<2x512xf32>
    %32 = arith.maximumf %30, %31 : vector<2x512xf32>
    %c0_24 = arith.constant 0 : index
    %c0_25 = arith.constant 0 : index
    %33 = vector.load %arg10[%c0_24, %c0_25] : memref<512x256xbf16, #tpu.memory_space<vmem>>, vector<512x256xbf16>
    %c0_26 = arith.constant 0 : index
    %c0_27 = arith.constant 0 : index
    %34 = vector.load %arg11[%c0_26, %c0_27] : memref<1x256xf32, #tpu.memory_space<vmem>>, vector<1x256xf32>
    %35 = arith.truncf %32 : vector<2x512xf32> to vector<2x512xbf16>
    %cst_28 = arith.constant dense<0.000000e+00> : vector<2x256xf32>
    %36 = tpu.matmul %35, %33, %cst_28 {dimension_numbers = #tpu.dot_dimension_numbers<[1], [0], [0], [1], [0, 0, 1, 1], [], []>} : vector<2x512xbf16>, vector<512x256xbf16>, vector<2x256xf32> -> vector<2x256xf32>
    %37 = vector.broadcast %34 : vector<1x256xf32> to vector<2x256xf32>
    %38 = arith.addf %36, %37 : vector<2x256xf32>
    %39 = arith.negf %38 : vector<2x256xf32>
    %40 = math.exp %39 : vector<2x256xf32>
    %cst_29 = arith.constant 1.000000e+00 : f32
    %41 = vector.broadcast %cst_29 : f32 to vector<2x256xf32>
    %42 = arith.addf %41, %40 : vector<2x256xf32>
    %43 = arith.divf %41, %42 : vector<2x256xf32>
    %c0_30 = arith.constant 0 : index
    %c0_31 = arith.constant 0 : index
    %44 = vector.load %arg12[%c0_30, %c0_31] : memref<2x256xf32, #tpu.memory_space<vmem>>, vector<2x256xf32>
    tpu.vector_store %arg12[%c0_30, %c0_31], %43 {strides = array<i32>} : memref<2x256xf32, #tpu.memory_space<vmem>>, vector<2x256xf32>,
    return
  }
  func.func @transform_0(%arg0: i32) -> (i32, i32) {
    %c0_i32 = arith.constant 0 : i32
    %c0_i32_0 = arith.constant 0 : i32
    return %arg0, %c0_i32 : i32, i32
  }
  func.func @transform_1(%arg0: i32) -> (i32, i32) {
    %c0_i32 = arith.constant 0 : i32
    %c0_i32_0 = arith.constant 0 : i32
    %c0_i32_1 = arith.constant 0 : i32
    return %c0_i32, %c0_i32_0 : i32, i32
  }
  func.func @transform_2(%arg0: i32) -> (i32, i32) {
    %c0_i32 = arith.constant 0 : i32
    %c0_i32_0 = arith.constant 0 : i32
    %c0_i32_1 = arith.constant 0 : i32
    return %c0_i32, %c0_i32_0 : i32, i32
  }
  func.func @transform_3(%arg0: i32) -> (i32, i32) {
    %c0_i32 = arith.constant 0 : i32
    %c0_i32_0 = arith.constant 0 : i32
    %c0_i32_1 = arith.constant 0 : i32
    return %c0_i32, %c0_i32_0 : i32, i32
  }
  func.func @transform_4(%arg0: i32) -> (i32, i32) {
    %c0_i32 = arith.constant 0 : i32
    %c0_i32_0 = arith.constant 0 : i32
    %c0_i32_1 = arith.constant 0 : i32
    return %c0_i32, %c0_i32_0 : i32, i32
  }
  func.func @transform_5(%arg0: i32) -> (i32, i32) {
    %c0_i32 = arith.constant 0 : i32
    %c0_i32_0 = arith.constant 0 : i32
    %c0_i32_1 = arith.constant 0 : i32
    return %c0_i32, %c0_i32_0 : i32, i32
  }
  func.func @transform_6(%arg0: i32) -> (i32, i32) {
    %c0_i32 = arith.constant 0 : i32
    %c0_i32_0 = arith.constant 0 : i32
    %c0_i32_1 = arith.constant 0 : i32
    return %c0_i32, %c0_i32_0 : i32, i32
  }
  func.func @transform_7(%arg0: i32) -> (i32, i32) {
    %c0_i32 = arith.constant 0 : i32
    %c0_i32_0 = arith.constant 0 : i32
    %c0_i32_1 = arith.constant 0 : i32
    return %c0_i32, %c0_i32_0 : i32, i32
  }
  func.func @transform_8(%arg0: i32) -> (i32, i32) {
    %c0_i32 = arith.constant 0 : i32
    %c0_i32_0 = arith.constant 0 : i32
    %c0_i32_1 = arith.constant 0 : i32
    return %c0_i32, %c0_i32_0 : i32, i32
  }
  func.func @transform_9(%arg0: i32) -> (i32, i32) {
    %c0_i32 = arith.constant 0 : i32
    %c0_i32_0 = arith.constant 0 : i32
    %c0_i32_1 = arith.constant 0 : i32
    return %c0_i32, %c0_i32_0 : i32, i32
  }
  func.func @transform_10(%arg0: i32) -> (i32, i32) {
    %c0_i32 = arith.constant 0 : i32
    %c0_i32_0 = arith.constant 0 : i32
    %c0_i32_1 = arith.constant 0 : i32
    return %c0_i32, %c0_i32_0 : i32, i32
  }
  func.func @transform_11(%arg0: i32) -> (i32, i32) {
    %c0_i32 = arith.constant 0 : i32
    %c0_i32_0 = arith.constant 0 : i32
    return %arg0, %c0_i32 : i32, i32
  }
}

</mosaic_0001>

<bundles_post_ra>
// kernel: forward.1
= control target key start
LH: loop header
LB: loop body
LE: loop exit
PB: predicated region body
PF: predicated region fallthrough
CT: control target
= control target key end

     0   :  { %s5529_s1 = inlined_call_operand.vmem [shape: bf16[256,1024], index: 1, kind: input, shape index: {}]   ;;  %s5530_s0 = inlined_call_operand.vmem [shape: f32[2,256], index: 0, kind: input, shape index: {}]   ;;  %s5531_s3 = inlined_call_operand.vmem [shape: bf16[1024,256], index: 3, kind: input, shape index: {}]   ;;  %s5532_s2 = inlined_call_operand.vmem [shape: f32[1,1024], index: 2, kind: input, shape index: {}]   ;;  %s5533_s5 = inlined_call_operand.vmem [shape: bf16[256,256], index: 5, kind: input, shape index: {}]   ;;  %s5534_s7 = inlined_call_operand.vmem [shape: bf16[256,512], index: 7, kind: input, shape index: {}]   ;;  %s5535_s4 = inlined_call_operand.vmem [shape: f32[1,256], index: 4, kind: input, shape index: {}]   ;;  %s5536_s9 = inlined_call_operand.vmem [shape: bf16[512,256], index: 9, kind: input, shape index: {}]   ;;  %s5537_s6 = inlined_call_operand.vmem [shape: f32[1,256], index: 6, kind: input, shape index: {}]   ;;  %s5538_s8 = inlined_call_operand.vmem [shape: f32[1,512], index: 8, kind: input, shape index: {}]   ;;  %s5539_s10 = inlined_call_operand.vmem [shape: f32[1,256], index: 10, kind: input, shape index: {}]   ;;  %s5540_s11 = inlined_call_operand.vmem [shape: f32[2,256], index: 11, kind: output, shape index: {}]  }
   0x1   :  { %v39_v0 = vld [vmem:[%s5529_s1] sm:$0xff]  ;;  %v40_v17 = vld [vmem:[%s5529_s1 + $0x8] sm:$0xff] }
   0x2   :  { %v43_v1 = vld [vmem:[%s5529_s1 + $0x20] sm:$0xff]  ;;  %v44_v18 = vld [vmem:[%s5529_s1 + $0x28] sm:$0xff] }
   0x3   :  { %v47_v2 = vld [vmem:[%s5529_s1 + $0x40] sm:$0xff]  ;;  %v3243_v3 = vcombine.high %v39_v0, %v43_v1  ;;  %v3242_v4 = vcombine.low %v39_v0, %v43_v1  ;;  %v48_v20 = vld [vmem:[%s5529_s1 + $0x48] sm:$0xff]  ;;  %v3245_v22 = vcombine.high %v40_v17, %v44_v18  ;;  %v3244_v23 = vcombine.low %v40_v17, %v44_v18 }
   0x4   :  { %v51_v5 = vld [vmem:[%s5529_s1 + $0x60] sm:$0xff]  ;;  %v52_v25 = vld [vmem:[%s5529_s1 + $0x68] sm:$0xff] }
   0x5   :  { %v3251_v6 = vcombine.high %v47_v2, %v51_v5  ;;  %v55_v7 = vld [vmem:[%s5529_s1 + $0x80] sm:$0xff]  ;;  %862 = vmatprep.subr.bf16.mxu0 %v3243_v3  ;;  %v3250_v9 = vcombine.low %v47_v2, %v51_v5  ;;  %v3253_v27 = vcombine.high %v48_v20, %v52_v25  ;;  %v56_v28 = vld [vmem:[%s5529_s1 + $0x88] sm:$0xff]  ;;  %903 = vmatprep.subr.bf16.mxu1 %v3245_v22 }
   0x6   :  { %v59_v8 = vld [vmem:[%s5529_s1 + $0xa0] sm:$0xff]  ;;  %863 = vmatpush1.bf16.msra.mxu0 %v3242_v4  ;;  %v60_v29 = vld [vmem:[%s5529_s1 + $0xa8] sm:$0xff]  ;;  %904 = vmatpush1.bf16.msra.mxu1 %v3244_v23  ;;  %v3252_v33 = vcombine.low %v48_v20, %v52_v25 }
   0x7   :  { %864 = vmatprep.subr.bf16.mxu0 %v3251_v6  ;;  %v3259_v10 = vcombine.high %v55_v7, %v59_v8  ;;  %v63_v11 = vld [vmem:[%s5529_s1 + $0xc0] sm:$0xff]  ;;  %v3258_v13 = vcombine.low %v55_v7, %v59_v8  ;;  %v3261_v35 = vcombine.high %v56_v28, %v60_v29  ;;  %905 = vmatprep.subr.bf16.mxu1 %v3253_v27  ;;  %v64_v37 = vld [vmem:[%s5529_s1 + $0xc8] sm:$0xff] }
   0x8   :  { %v67_v12 = vld [vmem:[%s5529_s1 + $0xe0] sm:$0xff]  ;;  %v68_v38 = vld [vmem:[%s5529_s1 + $0xe8] sm:$0xff]  ;;  %v3260_v41 = vcombine.low %v56_v28, %v60_v29 }
   0x9   :  { %v3267_v14 = vcombine.high %v63_v11, %v67_v12  ;;  %v71_v15 = vld [vmem:[%s5529_s1 + $0x100] sm:$0xff]  ;;  %v3266_v21 = vcombine.low %v63_v11, %v67_v12  ;;  %v3269_v43 = vcombine.high %v64_v37, %v68_v38  ;;  %v72_v45 = vld [vmem:[%s5529_s1 + $0x108] sm:$0xff]  ;;  %v3268_v49 = vcombine.low %v64_v37, %v68_v38 }
   0xa   :  { %865 = vmatpush1.bf16.msra.mxu0 %v3250_v9  ;;  %v75_v16 = vld [vmem:[%s5529_s1 + $0x120] sm:$0xff]  ;;  %906 = vmatpush1.bf16.msra.mxu1 %v3252_v33  ;;  %v76_v46 = vld [vmem:[%s5529_s1 + $0x128] sm:$0xff] }
   0xb   :  { %866 = vmatprep.subr.bf16.mxu0 %v3259_v10  ;;  %v4220_v19 = vld.sshfl [vmem:[%s5530_s0] sm:$0x33 pattern:$0x76325410]  ;;  %v3275_v26 = vcombine.high %v71_v15, %v75_v16  ;;  %v3274_v34 = vcombine.low %v71_v15, %v75_v16  ;;  %907 = vmatprep.subr.bf16.mxu1 %v3261_v35  ;;  %v3277_v51 = vcombine.high %v72_v45, %v76_v46  ;;  %v80_v53 = vld [vmem:[%s5529_s1 + $0x148] sm:$0xff] }
   0xc   :  { %v176_v24 = vcombine.high %v4220_v19, %v4220_v19  ;;  %v79_v30 = vld [vmem:[%s5529_s1 + $0x140] sm:$0xff]  ;;  %v84_v54 = vld [vmem:[%s5529_s1 + $0x168] sm:$0xff]  ;;  %v3276_v57 = vcombine.low %v72_v45, %v76_v46 }
   0xd   :  { %v83_v31 = vld [vmem:[%s5529_s1 + $0x160] sm:$0xff]  ;;  %v3285_v59 = vcombine.high %v80_v53, %v84_v54  ;;  %v88_v61 = vld [vmem:[%s5529_s1 + $0x188] sm:$0xff]  ;;  %v3284_v1 = vcombine.low %v80_v53, %v84_v54 }
   0xe   :  { %867 = vmatpush1.bf16.msra.mxu0 %v3258_v13  ;;  %v4242_v32 = vpack.c.bf16 %v176_v24, %v176_v24  ;;  %v3283_v36 = vcombine.high %v79_v30, %v83_v31  ;;  %v87_v39 = vld [vmem:[%s5529_s1 + $0x180] sm:$0xff]  ;;  %v3282_v42 = vcombine.low %v79_v30, %v83_v31  ;;  %908 = vmatpush1.bf16.msra.mxu1 %v3260_v41  ;;  %v92_v62 = vld [vmem:[%s5529_s1 + $0x1a8] sm:$0xff] }
   0xf   :  { %868 = vmatprep.subr.bf16.mxu0 %v3267_v14  ;;  %v91_v40 = vld [vmem:[%s5529_s1 + $0x1a0] sm:$0xff]  ;;  %909 = vmatprep.subr.bf16.mxu1 %v3269_v43  ;;  %v3293_v3 = vcombine.high %v88_v61, %v92_v62  ;;  %v96_v5 = vld [vmem:[%s5529_s1 + $0x1c8] sm:$0xff]  ;;  %v3292_v9 = vcombine.low %v88_v61, %v92_v62 }
  0x10   :  { %894 = vmatprep.mubr.bf16.mxu0 %v4242_v32  ;;  %935 = vmatprep.mubr.bf16.mxu1 %v4242_v32  ;;  %v3291_v44 = vcombine.high %v87_v39, %v91_v40  ;;  %v95_v47 = vld [vmem:[%s5529_s1 + $0x1c0] sm:$0xff]  ;;  %v3290_v50 = vcombine.low %v87_v39, %v91_v40  ;;  %v100_v6 = vld [vmem:[%s5529_s1 + $0x1e8] sm:$0xff] }
  0x11   :  { %v99_v48 = vld [vmem:[%s5529_s1 + $0x1e0] sm:$0xff]  ;;  %v3301_v11 = vcombine.high %v96_v5, %v100_v6  ;;  %v104_v13 = vld [vmem:[%s5529_s1 + $0x208] sm:$0xff]  ;;  %v3300_v17 = vcombine.low %v96_v5, %v100_v6 }
  0x12   :  { %869 = vmatpush1.bf16.msra.mxu0 %v3266_v21  ;;  %v3299_v52 = vcombine.high %v95_v47, %v99_v48  ;;  %v103_v55 = vld [vmem:[%s5529_s1 + $0x200] sm:$0xff]  ;;  %910 = vmatpush1.bf16.msra.mxu1 %v3268_v49  ;;  %v3298_v58 = vcombine.low %v95_v47, %v99_v48  ;;  %v108_v14 = vld [vmem:[%s5529_s1 + $0x228] sm:$0xff] }
  0x13   :  { %870 = vmatprep.subr.bf16.mxu0 %v3275_v26  ;;  %v107_v56 = vld [vmem:[%s5529_s1 + $0x220] sm:$0xff]  ;;  %911 = vmatprep.subr.bf16.mxu1 %v3277_v51  ;;  %v3309_v20 = vcombine.high %v104_v13, %v108_v14  ;;  %v112_v22 = vld [vmem:[%s5529_s1 + $0x248] sm:$0xff]  ;;  %v3308_v26 = vcombine.low %v104_v13, %v108_v14  ;;  %v46_v13 = vld [vmem:[%s5529_s1 + $0x38] sm:$0xff] }
  0x14   :  { %v3307_v60 = vcombine.high %v103_v55, %v107_v56  ;;  %v111_v63 = vld [vmem:[%s5529_s1 + $0x240] sm:$0xff]  ;;  %v3306_v2 = vcombine.low %v103_v55, %v107_v56  ;;  %v116_v23 = vld [vmem:[%s5529_s1 + $0x268] sm:$0xff] }
  0x15   :  { %v115_v0 = vld [vmem:[%s5529_s1 + $0x260] sm:$0xff]  ;;  %v3317_v28 = vcombine.high %v112_v22, %v116_v23  ;;  %v120_v30 = vld [vmem:[%s5529_s1 + $0x288] sm:$0xff]  ;;  %v3316_v35 = vcombine.low %v112_v22, %v116_v23  ;;  %v54_v22 = vld [vmem:[%s5529_s1 + $0x78] sm:$0xff] }
  0x16   :  { %871 = vmatpush1.bf16.msra.mxu0 %v3274_v34  ;;  %912 = vmatpush1.bf16.msra.mxu1 %v3276_v57  ;;  %v3315_v4 = vcombine.high %v111_v63, %v115_v0  ;;  %v119_v7 = vld [vmem:[%s5529_s1 + $0x280] sm:$0xff]  ;;  %v3314_v10 = vcombine.low %v111_v63, %v115_v0  ;;  %v124_v31 = vld [vmem:[%s5529_s1 + $0x2a8] sm:$0xff]  ;;  %v41_v57 = vld [vmem:[%s5529_s1 + $0x10] sm:$0xff] }
  0x17   :  { %872 = vmatprep.subr.bf16.mxu0 %v3283_v36  ;;  %913 = vmatprep.subr.bf16.mxu1 %v3285_v59  ;;  %v123_v8 = vld [vmem:[%s5529_s1 + $0x2a0] sm:$0xff]  ;;  %v3325_v37 = vcombine.high %v120_v30, %v124_v31  ;;  %v128_v39 = vld [vmem:[%s5529_s1 + $0x2c8] sm:$0xff]  ;;  %v3324_v43 = vcombine.low %v120_v30, %v124_v31  ;;  %v62_v30 = vld [vmem:[%s5529_s1 + $0xb8] sm:$0xff] }
  0x18   :  { %v3323_v12 = vcombine.high %v119_v7, %v123_v8  ;;  %v127_v15 = vld [vmem:[%s5529_s1 + $0x2c0] sm:$0xff]  ;;  %v3322_v18 = vcombine.low %v119_v7, %v123_v8  ;;  %v132_v40 = vld [vmem:[%s5529_s1 + $0x2e8] sm:$0xff] }
  0x19   :  { %v131_v16 = vld [vmem:[%s5529_s1 + $0x2e0] sm:$0xff]  ;;  %v3333_v45 = vcombine.high %v128_v39, %v132_v40  ;;  %v136_v47 = vld [vmem:[%s5529_s1 + $0x308] sm:$0xff]  ;;  %v3332_v51 = vcombine.low %v128_v39, %v132_v40  ;;  %v70_v39 = vld [vmem:[%s5529_s1 + $0xf8] sm:$0xff] }
  0x1a   :  { %873 = vmatpush1.bf16.msra.mxu0 %v3282_v42  ;;  %914 = vmatpush1.bf16.msra.mxu1 %v3284_v1  ;;  %v3331_v21 = vcombine.high %v127_v15, %v131_v16  ;;  %v135_v24 = vld [vmem:[%s5529_s1 + $0x300] sm:$0xff]  ;;  %v3330_v27 = vcombine.low %v127_v15, %v131_v16  ;;  %v140_v48 = vld [vmem:[%s5529_s1 + $0x328] sm:$0xff]  ;;  %v49_v1 = vld [vmem:[%s5529_s1 + $0x50] sm:$0xff] }
  0x1b   :  { %874 = vmatprep.subr.bf16.mxu0 %v3291_v44  ;;  %915 = vmatprep.subr.bf16.mxu1 %v3293_v3  ;;  %v139_v25 = vld [vmem:[%s5529_s1 + $0x320] sm:$0xff]  ;;  %v3341_v53 = vcombine.high %v136_v47, %v140_v48  ;;  %v144_v55 = vld [vmem:[%s5529_s1 + $0x348] sm:$0xff]  ;;  %v3340_v59 = vcombine.low %v136_v47, %v140_v48  ;;  %v4392_v3 = vpack.c.bf16 %v4220_v19, %v4220_v19  ;;  %v61_v19 = vld [vmem:[%s5529_s1 + $0xb0] sm:$0xff] }
  0x1c   :  { %v3339_v29 = vcombine.high %v135_v24, %v139_v25  ;;  %v143_v33 = vld [vmem:[%s5529_s1 + $0x340] sm:$0xff]  ;;  %v3338_v36 = vcombine.low %v135_v24, %v139_v25  ;;  %v148_v56 = vld [vmem:[%s5529_s1 + $0x368] sm:$0xff]  ;;  %v65_v16 = vld [vmem:[%s5529_s1 + $0xd0] sm:$0xff] }
  0x1d   :  { %v147_v34 = vld [vmem:[%s5529_s1 + $0x360] sm:$0xff]  ;;  %v3349_v61 = vcombine.high %v144_v55, %v148_v56  ;;  %v152_v62 = vld [vmem:[%s5529_s1 + $0x388] sm:$0xff]  ;;  %v73_v24 = vld [vmem:[%s5529_s1 + $0x110] sm:$0xff] }
  0x1e   :  { %875 = vmatpush1.bf16.msra.mxu0 %v3290_v50  ;;  %916 = vmatpush1.bf16.msra.mxu1 %v3292_v9  ;;  %v3347_v38 = vcombine.high %v143_v33, %v147_v34  ;;  %v151_v41 = vld [vmem:[%s5529_s1 + $0x380] sm:$0xff]  ;;  %v3346_v44 = vcombine.low %v143_v33, %v147_v34  ;;  %v156_v63 = vld [vmem:[%s5529_s1 + $0x3a8] sm:$0xff]  ;;  %v57_v9 = vld [vmem:[%s5529_s1 + $0x90] sm:$0xff] }
  0x1f   :  { %876 = vmatprep.subr.bf16.mxu0 %v3299_v52  ;;  %917 = vmatprep.subr.bf16.mxu1 %v3301_v11  ;;  %v155_v42 = vld [vmem:[%s5529_s1 + $0x3a0] sm:$0xff]  ;;  %v160_v5 = vld [vmem:[%s5529_s1 + $0x3c8] sm:$0xff]  ;;  %v3357_v7 = vcombine.high %v152_v62, %v156_v63  ;;  %v3356_v11 = vcombine.low %v152_v62, %v156_v63  ;;  %v3262_v23 = vcombine.low %v57_v9, %v61_v19  ;;  %v77_v25 = vld [vmem:[%s5529_s1 + $0x130] sm:$0xff] }
  0x20   :  { %v3355_v46 = vcombine.high %v151_v41, %v155_v42  ;;  %v159_v49 = vld [vmem:[%s5529_s1 + $0x3c0] sm:$0xff]  ;;  %v3354_v52 = vcombine.low %v151_v41, %v155_v42  ;;  %v164_v6 = vld [vmem:[%s5529_s1 + $0x3e8] sm:$0xff]  ;;  %v81_v33 = vld [vmem:[%s5529_s1 + $0x150] sm:$0xff]  ;;  %v3278_v40 = vcombine.low %v73_v24, %v77_v25 }
  0x21   :  { %v163_v50 = vld [vmem:[%s5529_s1 + $0x3e0] sm:$0xff]  ;;  %v3365_v14 = vcombine.high %v160_v5, %v164_v6  ;;  %v85_v34 = vld [vmem:[%s5529_s1 + $0x170] sm:$0xff]  ;;  %v94_v62 = vld [vmem:[%s5529_s1 + $0x1b8] sm:$0xff] }
  0x22   :  { %877 = vmatpush1.bf16.msra.mxu0 %v3298_v58  ;;  %918 = vmatpush1.bf16.msra.mxu1 %v3300_v17  ;;  %v3363_v54 = vcombine.high %v159_v49, %v163_v50  ;;  %v45_v58 = vld [vmem:[%s5529_s1 + $0x30] sm:$0xff]  ;;  %v3286_v47 = vcombine.low %v81_v33, %v85_v34 }
  0x23   :  { %878 = vmatprep.subr.bf16.mxu0 %v3307_v60  ;;  %919 = vmatprep.subr.bf16.mxu1 %v3309_v20  ;;  %v3362_v60 = vcombine.low %v159_v49, %v163_v50  ;;  %v3247_v0 = vcombine.high %v41_v57, %v45_v58  ;;  %v3246_v8 = vcombine.low %v41_v57, %v45_v58  ;;  %v69_v17 = vld [vmem:[%s5529_s1 + $0xf0] sm:$0xff] }
  0x24   :  { %v3364_v20 = vcombine.low %v160_v5, %v164_v6  ;;  %v3270_v31 = vcombine.low %v65_v16, %v69_v17  ;;  %v89_v41 = vld [vmem:[%s5529_s1 + $0x190] sm:$0xff] }
  0x25   :  { %v93_v42 = vld [vmem:[%s5529_s1 + $0x1b0] sm:$0xff] }
  0x26   :  { %879 = vmatpush1.bf16.msra.mxu0 %v3306_v2  ;;  %920 = vmatpush1.bf16.msra.mxu1 %v3308_v26  ;;  %v53_v2 = vld [vmem:[%s5529_s1 + $0x70] sm:$0xff] }
  0x27   :  { %880 = vmatprep.subr.bf16.mxu0 %v3315_v4  ;;  %921 = vmatprep.subr.bf16.mxu1 %v3317_v28  ;;  %v3348_v4 = vcombine.low %v144_v55, %v148_v56  ;;  %v3254_v15 = vcombine.low %v49_v1, %v53_v2  ;;  %v97_v48 = vld [vmem:[%s5529_s1 + $0x1d0] sm:$0xff]  ;;  %v3294_v55 = vcombine.low %v89_v41, %v93_v42 }
  0x28   :  { %v101_v49 = vld [vmem:[%s5529_s1 + $0x1f0] sm:$0xff] }
  0x29   :  { %v105_v56 = vld [vmem:[%s5529_s1 + $0x210] sm:$0xff]  ;;  %v3302_v63 = vcombine.low %v97_v48, %v101_v49 }
  0x2a   :  { %881 = vmatpush1.bf16.msra.mxu0 %v3314_v10  ;;  %922 = vmatpush1.bf16.msra.mxu1 %v3316_v35  ;;  %v3255_v10 = vcombine.high %v49_v1, %v53_v2  ;;  %v109_v57 = vld [vmem:[%s5529_s1 + $0x230] sm:$0xff] }
  0x2b   :  { %882 = vmatprep.subr.bf16.mxu0 %v3323_v12  ;;  %923 = vmatprep.subr.bf16.mxu1 %v3325_v37  ;;  %v42_v12 = vld [vmem:[%s5529_s1 + $0x18] sm:$0xff]  ;;  %v117_v1 = vld [vmem:[%s5529_s1 + $0x270] sm:$0xff]  ;;  %v3310_v6 = vcombine.low %v105_v56, %v109_v57 }
  0x2c   :  { %v3249_v26 = vcombine.high %v42_v12, %v46_v13  ;;  %v3248_v28 = vcombine.low %v42_v12, %v46_v13 }
  0x2e   :  { %883 = vmatpush1.bf16.msra.mxu0 %v3322_v18  ;;  %924 = vmatpush1.bf16.msra.mxu1 %v3324_v43  ;;  %v3263_v18 = vcombine.high %v57_v9, %v61_v19  ;;  %v98_v9 = vld [vmem:[%s5529_s1 + $0x1d8] sm:$0xff] }
  0x2f   :  { %884 = vmatprep.subr.bf16.mxu0 %v3331_v21  ;;  %925 = vmatprep.subr.bf16.mxu1 %v3333_v45  ;;  %v50_v21 = vld [vmem:[%s5529_s1 + $0x58] sm:$0xff] }
  0x30   :  { %v3257_v35 = vcombine.high %v50_v21, %v54_v22  ;;  %v3256_v37 = vcombine.low %v50_v21, %v54_v22  ;;  %v102_v19 = vld [vmem:[%s5529_s1 + $0x1f8] sm:$0xff] }
  0x31   :  { %v3304_v21 = vcombine.low %v98_v9, %v102_v19 }
  0x32   :  { %885 = vmatpush1.bf16.msra.mxu0 %v3330_v27  ;;  %926 = vmatpush1.bf16.msra.mxu1 %v3332_v51  ;;  %v3271_v27 = vcombine.high %v65_v16, %v69_v17  ;;  %v3295_v51 = vcombine.high %v89_v41, %v93_v42  ;;  %v106_v16 = vld [vmem:[%s5529_s1 + $0x218] sm:$0xff] }
  0x33   :  { %886 = vmatprep.subr.bf16.mxu0 %v3339_v29  ;;  %927 = vmatprep.subr.bf16.mxu1 %v3341_v53  ;;  %v58_v29 = vld [vmem:[%s5529_s1 + $0x98] sm:$0xff] }
  0x34   :  { %v3265_v43 = vcombine.high %v58_v29, %v62_v30  ;;  %v3264_v45 = vcombine.low %v58_v29, %v62_v30  ;;  %v82_v53 = vld [vmem:[%s5529_s1 + $0x158] sm:$0xff] }
  0x35   :  { %v110_v17 = vld [vmem:[%s5529_s1 + $0x238] sm:$0xff] }
  0x36   :  { %887 = vmatpush1.bf16.msra.mxu0 %v3338_v36  ;;  %928 = vmatpush1.bf16.msra.mxu1 %v3340_v59  ;;  %v3279_v36 = vcombine.high %v73_v24, %v77_v25  ;;  %v3303_v59 = vcombine.high %v97_v48, %v101_v49  ;;  %v114_v25 = vld [vmem:[%s5529_s1 + $0x258] sm:$0xff]  ;;  %v3312_v29 = vcombine.low %v106_v16, %v110_v17 }
  0x37   :  { %888 = vmatprep.subr.bf16.mxu0 %v3347_v38  ;;  %929 = vmatprep.subr.bf16.mxu1 %v3349_v61  ;;  %v66_v38 = vld [vmem:[%s5529_s1 + $0xd8] sm:$0xff] }
  0x38   :  { %v3273_v50 = vcombine.high %v66_v38, %v70_v39  ;;  %v90_v61 = vld [vmem:[%s5529_s1 + $0x198] sm:$0xff] }
  0x39   :  { %v3296_v12 = vcombine.low %v90_v61, %v94_v62  ;;  %v130_v42 = vld [vmem:[%s5529_s1 + $0x2d8] sm:$0xff] }
  0x3a   :  { %889 = vmatpush1.bf16.msra.mxu0 %v3346_v44  ;;  %930 = vmatpush1.bf16.msra.mxu1 %v3348_v4  ;;  %v3287_v44 = vcombine.high %v81_v33, %v85_v34  ;;  %v3311_v4 = vcombine.high %v105_v56, %v109_v57  ;;  %v122_v34 = vld [vmem:[%s5529_s1 + $0x298] sm:$0xff] }
  0x3b   :  { %890 = vmatprep.subr.bf16.mxu0 %v3355_v46  ;;  %931 = vmatprep.subr.bf16.mxu1 %v3357_v7  ;;  %v78_v46 = vld [vmem:[%s5529_s1 + $0x138] sm:$0xff]  ;;  %v3297_v7 = vcombine.high %v90_v61, %v94_v62  ;;  %v3683_v62 = vld [vmem:[%s5531_s3 + $0x4] ss:$8 sps:$4 sm:$0xff]  }
  0x3c   :  { %v138_v49 = vld [vmem:[%s5529_s1 + $0x318] sm:$0xff] }
  0x3d   :  { %v146_v57 = vld [vmem:[%s5529_s1 + $0x358] sm:$0xff] }
  0x3e   :  { %891 = vmatpush1.bf16.msra.mxu0 %v3354_v52  ;;  %932 = vmatpush1.bf16.msra.mxu1 %v3356_v11  ;;  %v3272_v52 = vcombine.low %v66_v38, %v70_v39  ;;  %v125_v11 = vld [vmem:[%s5529_s1 + $0x2b0] sm:$0xff] }
  0x3f   :  { %892 = vmatprep.subr.bf16.mxu0 %v3363_v54  ;;  %933 = vmatprep.subr.bf16.mxu1 %v3365_v14  ;;  %v86_v54 = vld [vmem:[%s5529_s1 + $0x178] sm:$0xff]  ;;  %v3305_v14 = vcombine.high %v98_v9, %v102_v19 }
  0x40   :  { %v3289_v2 = vcombine.high %v82_v53, %v86_v54  ;;  %v3288_v5 = vcombine.low %v82_v53, %v86_v54  ;;  %v3684_v9 = vld [vmem:[%s5531_s3 + $0x10] ss:$8 sps:$4 sm:$0xff]  }
  0x42   :  { %893 = vmatpush1.bf16.msra.mxu0 %v3362_v60  ;;  %934 = vmatpush1.bf16.msra.mxu1 %v3364_v20  ;;  %v133_v20 = vld [vmem:[%s5529_s1 + $0x2f0] sm:$0xff] }
  0x43   :  { %944 = vmatprep.subr.bf16.mxu0 %v3247_v0  ;;  %985 = vmatprep.subr.bf16.mxu1 %v3249_v26  ;;  %v113_v0 = vld [vmem:[%s5529_s1 + $0x250] sm:$0xff]  ;;  %v118_v26 = vld [vmem:[%s5529_s1 + $0x278] sm:$0xff] }
  0x44   :  { %v3318_v13 = vcombine.low %v113_v0, %v117_v1  ;;  %v3320_v38 = vcombine.low %v114_v25, %v118_v26 }
  0x45   :  { %895 = vmatmul.mubr.bf16.vlgmr.msra.gmra.mrb[0].mxu0 %v4392_v3  ;;  %936 = vmatmul.mubr.bf16.vlgmr.msra.gmra.mrb[0].mxu1 %v4392_v3 }
  0x46   :  { %945 = vmatpush1.bf16.msra.mxu0 %v3246_v8  ;;  %976 = vmatprep.mubr.bf16.mxu0 %v4242_v32  ;;  %v3319_v8 = vcombine.high %v113_v0, %v117_v1  ;;  %v158_v0 = vld [vmem:[%s5529_s1 + $0x3b8] sm:$0xff] }
  0x47   :  { %946 = vmatprep.subr.bf16.mxu0 %v3255_v10  ;;  %986 = vmatpush1.bf16.msra.mxu1 %v3248_v28  ;;  %v121_v10 = vld [vmem:[%s5529_s1 + $0x290] sm:$0xff] }
  0x48   :  { %1017 = vmatprep.mubr.bf16.mxu1 %v4242_v32  ;;  %987 = vmatprep.subr.bf16.mxu1 %v3257_v35  ;;  %v74_v32 = vld [vmem:[%s5529_s1 + $0x118] sm:$0xff]  ;;  %v3326_v22 = vcombine.low %v121_v10, %v125_v11  ;;  %v141_v28 = vld [vmem:[%s5529_s1 + $0x330] sm:$0xff] }
  0x49   :  { %v3281_v58 = vcombine.high %v74_v32, %v78_v46  ;;  %v3280_v60 = vcombine.low %v74_v32, %v78_v46  ;;  %v126_v35 = vld [vmem:[%s5529_s1 + $0x2b8] sm:$0xff] }
  0x4a   :  { %947 = vmatpush1.bf16.msra.mxu0 %v3254_v15  ;;  %v3327_v15 = vcombine.high %v121_v10, %v125_v11  ;;  %v3328_v32 = vcombine.low %v122_v34, %v126_v35  ;;  %v3689_v10 = vld [vmem:[%s5531_s3 + $0x24] ss:$8 sps:$4 sm:$0xff]  }
  0x4b   :  { %948 = vmatprep.subr.bf16.mxu0 %v3263_v18  ;;  %988 = vmatpush1.bf16.msra.mxu1 %v3256_v37  ;;  %v129_v18 = vld [vmem:[%s5529_s1 + $0x2d0] sm:$0xff] }
  0x4c   :  { %989 = vmatprep.subr.bf16.mxu1 %v3265_v43  ;;  %v3335_v24 = vcombine.high %v129_v18, %v133_v20  ;;  %v3334_v30 = vcombine.low %v129_v18, %v133_v20  ;;  %v149_v37 = vld [vmem:[%s5529_s1 + $0x370] sm:$0xff]  ;;  %v134_v43 = vld [vmem:[%s5529_s1 + $0x2f8] sm:$0xff]  ;;  %v3699_v20 = vld [vmem:[%s5531_s3 + $0x60] ss:$8 sps:$4 sm:$0xff]  }
  0x4d   :  { %v3336_v53 = vcombine.low %v130_v42, %v134_v43  ;;  %v3696_v18 = vld [vmem:[%s5531_s3 + $0x50] ss:$8 sps:$4 sm:$0xff]  }
  0x4e   :  { %949 = vmatpush1.bf16.msra.mxu0 %v3262_v23  ;;  %v3313_v23 = vcombine.high %v106_v16, %v110_v17  ;;  %v3693_v16 = vld [vmem:[%s5531_s3 + $0x40] ss:$8 sps:$4 sm:$0xff]   ;;  %v3698_v17 = vld [vmem:[%s5531_s3 + $0x54] ss:$8 sps:$4 sm:$0xff]  }
  0x4f   :  { %950 = vmatprep.subr.bf16.mxu0 %v3271_v27  ;;  %990 = vmatpush1.bf16.msra.mxu1 %v3264_v45  ;;  %v137_v27 = vld [vmem:[%s5529_s1 + $0x310] sm:$0xff] }
  0x50   :  { %991 = vmatprep.subr.bf16.mxu1 %v3273_v50  ;;  %v3343_v33 = vcombine.high %v137_v27, %v141_v28  ;;  %v3342_v39 = vcombine.low %v137_v27, %v141_v28  ;;  %v157_v45 = vld [vmem:[%s5529_s1 + $0x3b0] sm:$0xff]  ;;  %v142_v50 = vld [vmem:[%s5529_s1 + $0x338] sm:$0xff]  ;;  %v3713_v27 = vld [vmem:[%s5531_s3 + $0xa4] ss:$8 sps:$4 sm:$0xff]  }
  0x51   :  { %v3711_v28 = vld [vmem:[%s5531_s3 + $0xa0] ss:$8 sps:$4 sm:$0xff]  }
  0x52   :  { %951 = vmatpush1.bf16.msra.mxu0 %v3270_v31  ;;  %v3321_v31 = vcombine.high %v114_v25, %v118_v26  ;;  %v3710_v25 = vld [vmem:[%s5531_s3 + $0x94] ss:$8 sps:$4 sm:$0xff]   ;;  %v3708_v26 = vld [vmem:[%s5531_s3 + $0x90] ss:$8 sps:$4 sm:$0xff]  }
  0x53   :  { %952 = vmatprep.subr.bf16.mxu0 %v3279_v36  ;;  %992 = vmatpush1.bf16.msra.mxu1 %v3272_v52  ;;  %v145_v36 = vld [vmem:[%s5529_s1 + $0x350] sm:$0xff] }
  0x54   :  { %993 = vmatprep.subr.bf16.mxu1 %v3281_v58  ;;  %v3351_v41 = vcombine.high %v145_v36, %v149_v37  ;;  %v3350_v46 = vcombine.low %v145_v36, %v149_v37  ;;  %v165_v52 = vld [vmem:[%s5529_s1 + $0x3f0] sm:$0xff]  ;;  %v150_v58 = vld [vmem:[%s5529_s1 + $0x378] sm:$0xff]  ;;  %v3725_v36 = vld [vmem:[%s5531_s3 + $0xe4] ss:$8 sps:$4 sm:$0xff]  }
  0x55   :  { %v3353_v61 = vcombine.high %v146_v57, %v150_v58  ;;  %v3352_v1 = vcombine.low %v146_v57, %v150_v58  ;;  %v3723_v37 = vld [vmem:[%s5531_s3 + $0xe0] ss:$8 sps:$4 sm:$0xff]  }
  0x56   :  { %953 = vmatpush1.bf16.msra.mxu0 %v3278_v40  ;;  %v3329_v40 = vcombine.high %v122_v34, %v126_v35  ;;  %v3722_v34 = vld [vmem:[%s5531_s3 + $0xd4] ss:$8 sps:$4 sm:$0xff]   ;;  %v3720_v35 = vld [vmem:[%s5531_s3 + $0xd0] ss:$8 sps:$4 sm:$0xff]   ;;  %v3729_v57 = vld [vmem:[%s5531_s3 + $0x100] ss:$8 sps:$4 sm:$0xff]  }
  0x57   :  { %954 = vmatprep.subr.bf16.mxu0 %v3287_v44  ;;  %994 = vmatpush1.bf16.msra.mxu1 %v3280_v60  ;;  %v153_v44 = vld [vmem:[%s5529_s1 + $0x390] sm:$0xff] }
  0x58   :  { %995 = vmatprep.subr.bf16.mxu1 %v3289_v2  ;;  %v3359_v48 = vcombine.high %v153_v44, %v157_v45  ;;  %v3358_v54 = vcombine.low %v153_v44, %v157_v45  ;;  %v3681_v2 = vld [vmem:[%s5531_s3] ss:$8 sps:$4 sm:$0xff]  }
  0x59   :  { %v4693_v44 = vld [vmem:[%s5532_s2] sm:$0xff] }
  0x5a   :  { %955 = vmatpush1.bf16.msra.mxu0 %v3286_v47  ;;  %v3337_v47 = vcombine.high %v130_v42, %v134_v43 }
  0x5b   :  { %956 = vmatprep.subr.bf16.mxu0 %v3295_v51  ;;  %996 = vmatpush1.bf16.msra.mxu1 %v3288_v5  ;;  %v161_v51 = vld [vmem:[%s5529_s1 + $0x3d0] sm:$0xff] }
  0x5c   :  { %997 = vmatprep.subr.bf16.mxu1 %v3297_v7  ;;  %v3367_v56 = vcombine.high %v161_v51, %v165_v52  ;;  %v3366_v60 = vcombine.low %v161_v51, %v165_v52  ;;  %v3686_v5 = vld [vmem:[%s5531_s3 + $0x14] ss:$8 sps:$4 sm:$0xff]  }
  0x5d   :  { %v166_v7 = vld [vmem:[%s5529_s1 + $0x3f8] sm:$0xff] }
  0x5e   :  { %957 = vmatpush1.bf16.msra.mxu0 %v3294_v55  ;;  %v3345_v55 = vcombine.high %v138_v49, %v142_v50 }
  0x5f   :  { %958 = vmatprep.subr.bf16.mxu0 %v3303_v59  ;;  %998 = vmatpush1.bf16.msra.mxu1 %v3296_v12  ;;  %v3344_v59 = vcombine.low %v138_v49, %v142_v50  ;;  %v3687_v12 = vld [vmem:[%s5531_s3 + $0x20] ss:$8 sps:$4 sm:$0xff]  }
  0x60   :  { %999 = vmatprep.subr.bf16.mxu1 %v3305_v14  ;;  %v3690_v14 = vld [vmem:[%s5531_s3 + $0x30] ss:$8 sps:$4 sm:$0xff]  }
  0x62   :  { %959 = vmatpush1.bf16.msra.mxu0 %v3302_v63  ;;  %v154_v63 = vld [vmem:[%s5529_s1 + $0x398] sm:$0xff] }
  0x63   :  { %960 = vmatprep.subr.bf16.mxu0 %v3311_v4  ;;  %1000 = vmatpush1.bf16.msra.mxu1 %v3304_v21  ;;  %v3361_v4 = vcombine.high %v154_v63, %v158_v0  ;;  %v3704_v21 = vld [vmem:[%s5531_s3 + $0x74] ss:$8 sps:$4 sm:$0xff]  }
  0x64   :  { %1001 = vmatprep.subr.bf16.mxu1 %v3313_v23  ;;  %v3707_v23 = vld [vmem:[%s5531_s3 + $0x84] ss:$8 sps:$4 sm:$0xff]  }
  0x66   :  { %961 = vmatpush1.bf16.msra.mxu0 %v3310_v6  ;;  %v162_v6 = vld [vmem:[%s5529_s1 + $0x3d8] sm:$0xff] }
  0x67   :  { %962 = vmatprep.subr.bf16.mxu0 %v3319_v8  ;;  %1002 = vmatpush1.bf16.msra.mxu1 %v3312_v29  ;;  %v3360_v8 = vcombine.low %v154_v63, %v158_v0  ;;  %v3369_v19 = vcombine.high %v162_v6, %v166_v7  ;;  %v3368_v11 = vcombine.low %v162_v6, %v166_v7  ;;  %v3716_v29 = vld [vmem:[%s5531_s3 + $0xb4] ss:$8 sps:$4 sm:$0xff]  }
  0x68   :  { %1003 = vmatprep.subr.bf16.mxu1 %v3321_v31  ;;  %v3719_v31 = vld [vmem:[%s5531_s3 + $0xc4] ss:$8 sps:$4 sm:$0xff]   ;;  %v3740_v6 = vld [vmem:[%s5531_s3 + $0x134] ss:$8 sps:$4 sm:$0xff]  }
  0x6a   :  { %963 = vmatpush1.bf16.msra.mxu0 %v3318_v13  ;;  %v3692_v13 = vld [vmem:[%s5531_s3 + $0x34] ss:$8 sps:$4 sm:$0xff]  }
  0x6b   :  { %964 = vmatprep.subr.bf16.mxu0 %v3327_v15  ;;  %1004 = vmatpush1.bf16.msra.mxu1 %v3320_v38  ;;  %v3695_v15 = vld [vmem:[%s5531_s3 + $0x44] ss:$8 sps:$4 sm:$0xff]   ;;  %v3728_v38 = vld [vmem:[%s5531_s3 + $0xf4] ss:$8 sps:$4 sm:$0xff]  }
  0x6c   :  { %1005 = vmatprep.subr.bf16.mxu1 %v3329_v40  ;;  %v3731_v40 = vld [vmem:[%s5531_s3 + $0x104] ss:$8 sps:$4 sm:$0xff]  }
  0x6e   :  { %965 = vmatpush1.bf16.msra.mxu0 %v3326_v22  ;;  %v3702_v22 = vld [vmem:[%s5531_s3 + $0x70] ss:$8 sps:$4 sm:$0xff]  }
  0x6f   :  { %966 = vmatprep.subr.bf16.mxu0 %v3335_v24  ;;  %1006 = vmatpush1.bf16.msra.mxu1 %v3328_v32  ;;  %v3705_v24 = vld [vmem:[%s5531_s3 + $0x80] ss:$8 sps:$4 sm:$0xff]  }
  0x70   :  { %1007 = vmatprep.subr.bf16.mxu1 %v3337_v47 }
  0x72   :  { %967 = vmatpush1.bf16.msra.mxu0 %v3334_v30  ;;  %v3714_v30 = vld [vmem:[%s5531_s3 + $0xb0] ss:$8 sps:$4 sm:$0xff]  }
  0x73   :  { %968 = vmatprep.subr.bf16.mxu0 %v3343_v33  ;;  %1008 = vmatpush1.bf16.msra.mxu1 %v3336_v53  ;;  %v3717_v33 = vld [vmem:[%s5531_s3 + $0xc0] ss:$8 sps:$4 sm:$0xff]  }
  0x74   :  { %1009 = vmatprep.subr.bf16.mxu1 %v3345_v55 }
  0x76   :  { %969 = vmatpush1.bf16.msra.mxu0 %v3342_v39  ;;  %v3726_v39 = vld [vmem:[%s5531_s3 + $0xf0] ss:$8 sps:$4 sm:$0xff]  }
  0x77   :  { %970 = vmatprep.subr.bf16.mxu0 %v3351_v41  ;;  %1010 = vmatpush1.bf16.msra.mxu1 %v3344_v59  ;;  %v182_v41 = vlaneseq  ;;  %v3734_v59 = vld [vmem:[%s5531_s3 + $0x114] ss:$8 sps:$4 sm:$0xff]  }
  0x78   :  { %1011 = vmatprep.subr.bf16.mxu1 %v3353_v61  ;;  %v3732_v61 = vld [vmem:[%s5531_s3 + $0x110] ss:$8 sps:$4 sm:$0xff]  }
  0x79   :  { %v4685_v42 = vshrl.u32 %v182_v41, 7  ;;  %v3774_v41 = vld [vmem:[%s5531_s3 + $0x1f0] ss:$8 sps:$4 sm:$0xff]  }
  0x7a   :  { %971 = vmatpush1.bf16.msra.mxu0 %v3350_v46 }
  0x7b   :  { %972 = vmatprep.subr.bf16.mxu0 %v3359_v48  ;;  %1012 = vmatpush1.bf16.msra.mxu1 %v3352_v1  ;;  %v4688_v43 = vsub.s32 0, %v4685_v42  ;;  %v4696_v45 = vsub.s32 1, %v4685_v42  ;;  %v196_v55 = vsub.s32 3, %v4685_v42 }
  0x7c   :  { %1013 = vmatprep.subr.bf16.mxu1 %v3361_v4  ;;  %v3735_v4 = vld [vmem:[%s5531_s3 + $0x120] ss:$8 sps:$4 sm:$0xff]  }
  0x7d   :  { %v185_v32 = vrot.slane %v4693_v44, %v4688_v43  ;;  %v189_v46 = vrot.slane %v4693_v44, %v4696_v45 }
  0x7e   :  { %973 = vmatpush1.bf16.msra.mxu0 %v3358_v54 }
  0x7f   :  { %974 = vmatprep.subr.bf16.mxu0 %v3367_v56  ;;  %1014 = vmatpush1.bf16.msra.mxu1 %v3360_v8 }
  0x80   :  { %1015 = vmatprep.subr.bf16.mxu1 %v3369_v19  ;;  %v3743_v19 = vld [vmem:[%s5531_s3 + $0x144] ss:$8 sps:$4 sm:$0xff]  }
  0x82   :  { %975 = vmatpush1.bf16.msra.mxu0 %v3366_v60  ;;  %v197_v60 = vrot.slane %v4693_v44, %v196_v55 }
  0x83   :  { %1822 = vmatprep.subr.bf16.mxu0 %v3683_v62  ;;  %1016 = vmatpush1.bf16.msra.mxu1 %v3368_v11  ;;  %v3737_v62 = vld [vmem:[%s5531_s3 + $0x124] ss:$8 sps:$4 sm:$0xff]   ;;  %v3746_v11 = vld [vmem:[%s5531_s3 + $0x154] ss:$8 sps:$4 sm:$0xff]  }
  0x85   :  { %977 = vmatmul.mubr.bf16.vlgmr.msra.gmra.mrb[4].mxu0 %v4392_v3 }
  0x86   :  { %1823 = vmatpush1.bf16.msra.mxu0 %v3681_v2  ;;  %1018 = vmatmul.mubr.bf16.vlgmr.msra.gmra.mrb[4].mxu1 %v4392_v3  ;;  %v3701_v3 = vld [vmem:[%s5531_s3 + $0x64] ss:$8 sps:$4 sm:$0xff]  }
  0x87   :  { %1824 = vmatprep.subr.bf16.mxu0 %v3686_v5 }
  0x8a   :  { %1825 = vmatpush1.bf16.msra.mxu0 %v3684_v9  ;;  %v3738_v9 = vld [vmem:[%s5531_s3 + $0x130] ss:$8 sps:$4 sm:$0xff]  }
  0x8b   :  { %1826 = vmatprep.subr.bf16.mxu0 %v3689_v10  ;;  %v3741_v10 = vld [vmem:[%s5531_s3 + $0x140] ss:$8 sps:$4 sm:$0xff]  }
  0x8e   :  { %1827 = vmatpush1.bf16.msra.mxu0 %v3687_v12  ;;  %v3744_v12 = vld [vmem:[%s5531_s3 + $0x150] ss:$8 sps:$4 sm:$0xff]  }
  0x8f   :  { %1828 = vmatprep.subr.bf16.mxu0 %v3692_v13  ;;  %v3749_v13 = vld [vmem:[%s5531_s3 + $0x164] ss:$8 sps:$4 sm:$0xff]  }
  0x92   :  { %1829 = vmatpush1.bf16.msra.mxu0 %v3690_v14  ;;  %v3747_v14 = vld [vmem:[%s5531_s3 + $0x160] ss:$8 sps:$4 sm:$0xff]  }
  0x93   :  { %1830 = vmatprep.subr.bf16.mxu0 %v3695_v15  ;;  %v3752_v15 = vld [vmem:[%s5531_s3 + $0x174] ss:$8 sps:$4 sm:$0xff]  }
  0x96   :  { %1831 = vmatpush1.bf16.msra.mxu0 %v3693_v16  ;;  %v3750_v16 = vld [vmem:[%s5531_s3 + $0x170] ss:$8 sps:$4 sm:$0xff]  }
  0x97   :  { %1832 = vmatprep.subr.bf16.mxu0 %v3698_v17  ;;  %v3755_v17 = vld [vmem:[%s5531_s3 + $0x184] ss:$8 sps:$4 sm:$0xff]  }
  0x9a   :  { %1833 = vmatpush1.bf16.msra.mxu0 %v3696_v18  ;;  %v3753_v18 = vld [vmem:[%s5531_s3 + $0x180] ss:$8 sps:$4 sm:$0xff]  }
  0x9b   :  { %1834 = vmatprep.subr.bf16.mxu0 %v3701_v3  ;;  %v3758_v3 = vld [vmem:[%s5531_s3 + $0x194] ss:$8 sps:$4 sm:$0xff]  }
  0x9e   :  { %1835 = vmatpush1.bf16.msra.mxu0 %v3699_v20  ;;  %v3756_v20 = vld [vmem:[%s5531_s3 + $0x190] ss:$8 sps:$4 sm:$0xff]  }
  0x9f   :  { %1836 = vmatprep.subr.bf16.mxu0 %v3704_v21  ;;  %v3761_v21 = vld [vmem:[%s5531_s3 + $0x1a4] ss:$8 sps:$4 sm:$0xff]  }
  0xa2   :  { %1837 = vmatpush1.bf16.msra.mxu0 %v3702_v22  ;;  %v3759_v22 = vld [vmem:[%s5531_s3 + $0x1a0] ss:$8 sps:$4 sm:$0xff]  }
  0xa3   :  { %1838 = vmatprep.subr.bf16.mxu0 %v3707_v23  ;;  %v3764_v23 = vld [vmem:[%s5531_s3 + $0x1b4] ss:$8 sps:$4 sm:$0xff]  }
  0xa6   :  { %1839 = vmatpush1.bf16.msra.mxu0 %v3705_v24  ;;  %v3762_v24 = vld [vmem:[%s5531_s3 + $0x1b0] ss:$8 sps:$4 sm:$0xff]  }
  0xa7   :  { %1840 = vmatprep.subr.bf16.mxu0 %v3710_v25  ;;  %v3767_v25 = vld [vmem:[%s5531_s3 + $0x1c4] ss:$8 sps:$4 sm:$0xff]  }
  0xaa   :  { %1841 = vmatpush1.bf16.msra.mxu0 %v3708_v26  ;;  %v192_v26 = vsub.s32 2, %v4685_v42 }
  0xab   :  { %1842 = vmatprep.subr.bf16.mxu0 %v3713_v27  ;;  %v3765_v27 = vld [vmem:[%s5531_s3 + $0x1c0] ss:$8 sps:$4 sm:$0xff]  }
  0xae   :  { %1843 = vmatpush1.bf16.msra.mxu0 %v3711_v28  ;;  %v3770_v28 = vld [vmem:[%s5531_s3 + $0x1d4] ss:$8 sps:$4 sm:$0xff]  }
  0xaf   :  { %1844 = vmatprep.subr.bf16.mxu0 %v3716_v29  ;;  %v193_v29 = vrot.slane %v4693_v44, %v192_v26 }
  0xb2   :  { %1845 = vmatpush1.bf16.msra.mxu0 %v3714_v30  ;;  %v3768_v30 = vld [vmem:[%s5531_s3 + $0x1d0] ss:$8 sps:$4 sm:$0xff]  }
  0xb3   :  { %1846 = vmatprep.subr.bf16.mxu0 %v3719_v31  ;;  %v204_v31 = vsub.s32 5, %v4685_v42 }
  0xb6   :  { %1847 = vmatpush1.bf16.msra.mxu0 %v3717_v33  ;;  %v3773_v33 = vld [vmem:[%s5531_s3 + $0x1e4] ss:$8 sps:$4 sm:$0xff]  }
  0xb7   :  { %1848 = vmatprep.subr.bf16.mxu0 %v3722_v34 }
  0xba   :  { %1849 = vmatpush1.bf16.msra.mxu0 %v3720_v35  ;;  %v3771_v35 = vld [vmem:[%s5531_s3 + $0x1e0] ss:$8 sps:$4 sm:$0xff]  }
  0xbb   :  { %1850 = vmatprep.subr.bf16.mxu0 %v3725_v36  ;;  %v205_v36 = vrot.slane %v4693_v44, %v204_v31  ;;  %v3809_v31 = vld [vmem:[%s5531_s3 + $0x2a4] ss:$8 sps:$4 sm:$0xff]  }
  0xbe   :  { %1851 = vmatpush1.bf16.msra.mxu0 %v3723_v37  ;;  %v3776_v37 = vld [vmem:[%s5531_s3 + $0x1f4] ss:$8 sps:$4 sm:$0xff]  }
  0xbf   :  { %1852 = vmatprep.subr.bf16.mxu0 %v3728_v38 }
  0xc2   :  { %1853 = vmatpush1.bf16.msra.mxu0 %v3726_v39 }
  0xc3   :  { %1863 = vmatprep.subr.bf16.mxu0 %v3731_v40 }
 0x118   :  { %v896_v47 = vpop.f32.mrb[0].mxu0  ;;  %v937_v63 = vpop.f32.mrb[0].mxu1 }
 0x119   :  { %v897_v48 = vadd.f32 %v896_v47, %v185_v32  ;;  %v898_v49 = vpop.f32.mrb[1].mxu0  ;;  %v939_v0 = vpop.f32.mrb[1].mxu1  ;;  %v938_v34 = vadd.f32 %v937_v63, %v193_v29  ;;  %v3779_v47 = vld [vmem:[%s5531_s3 + $0x204] ss:$8 sps:$4 sm:$0xff]   ;;  %v3788_v63 = vld [vmem:[%s5531_s3 + $0x234] ss:$8 sps:$4 sm:$0xff]  }
 0x11a   :  { %v899_v50 = vadd.f32 %v898_v49, %v189_v46  ;;  %v900_v51 = vpop.f32.mrb[2].mxu0  ;;  %v940_v1 = vadd.f32 %v939_v0, %v197_v60  ;;  %v941_v2 = vpop.f32.mrb[2].mxu1  ;;  %v3804_v29 = vld [vmem:[%s5531_s3 + $0x290] ss:$8 sps:$4 sm:$0xff]  }
 0x11b   :  { %v1026_v52 = vmax.f32 %v897_v48, 0.0  ;;  %v901_v53 = vpop.f32.mrb[3].mxu0  ;;  %v942_v5 = vpop.f32.mrb[3].mxu1  ;;  %v1028_v39 = vmax.f32 %v938_v34, 0.0  ;;  %v3777_v51 = vld [vmem:[%s5531_s3 + $0x200] ss:$8 sps:$4 sm:$0xff]  }
 0x11c   :  { %v1027_v54 = vmax.f32 %v899_v50, 0.0  ;;  %v1029_v7 = vmax.f32 %v940_v1, 0.0  ;;  %v3782_v53 = vld [vmem:[%s5531_s3 + $0x214] ss:$8 sps:$4 sm:$0xff]   ;;  %v3876_v2 = vld [vmem:[%s5533_s5 + $0x10] ss:$8 sps:$4 sm:$0xff]  }
 0x11d   :  { %v1163_v58 = vpack.c.bf16 %v1026_v52, %v1026_v52  ;;  %v1165_v50 = vpack.c.bf16 %v1028_v39, %v1028_v39  ;;  %v3786_v5 = vld [vmem:[%s5531_s3 + $0x230] ss:$8 sps:$4 sm:$0xff]   ;;  %v3807_v34 = vld [vmem:[%s5531_s3 + $0x2a0] ss:$8 sps:$4 sm:$0xff]  }
 0x11e   :  { %v1164_v56 = vpack.c.bf16 %v1027_v54, %v1027_v54  ;;  %v1166_v8 = vpack.c.bf16 %v1029_v7, %v1029_v7  ;;  %v3780_v54 = vld [vmem:[%s5531_s3 + $0x210] ss:$8 sps:$4 sm:$0xff]   ;;  %v3879_v7 = vld [vmem:[%s5533_s5 + $0x20] ss:$8 sps:$4 sm:$0xff]  }
 0x11f   :  { %v3810_v39 = vld [vmem:[%s5531_s3 + $0x2b0] ss:$8 sps:$4 sm:$0xff]  }
 0x120   :  { %1854 = vmatprep.mubr.bf16.mxu0 %v1164_v56  ;;  %v3785_v56 = vld [vmem:[%s5531_s3 + $0x224] ss:$8 sps:$4 sm:$0xff]  }
 0x121   :  { %1855 = vmatmul.mubr.bf16.vlgmr.msra.gmra.mrb[8].mxu0 %v1163_v58 }
 0x122   :  { %1864 = vmatpush1.bf16.msra.mxu0 %v3729_v57  ;;  %1895 = vmatprep.mubr.bf16.mxu0 %v1166_v8  ;;  %v3873_v57 = vld [vmem:[%s5533_s5] ss:$8 sps:$4 sm:$0xff]   ;;  %v3884_v8 = vld [vmem:[%s5533_s5 + $0x34] ss:$8 sps:$4 sm:$0xff]  }
 0x123   :  { %1865 = vmatprep.subr.bf16.mxu0 %v3734_v59  ;;  %v3875_v59 = vld [vmem:[%s5533_s5 + $0x4] ss:$8 sps:$4 sm:$0xff]  }
 0x124   :  { %2194 = vmatprep.subr.bf16.mxu1 %v3875_v59  ;;  %v3914_v59 = vld [vmem:[%s5533_s5 + $0xd4] ss:$8 sps:$4 sm:$0xff]  }
 0x125   :  { %2195 = vmatpush1.bf16.msra.mxu1 %v3873_v57  ;;  %v3821_v57 = vld [vmem:[%s5531_s3 + $0x2e4] ss:$8 sps:$4 sm:$0xff]  }
 0x126   :  { %1866 = vmatpush1.bf16.msra.mxu0 %v3732_v61  ;;  %v3878_v61 = vld [vmem:[%s5533_s5 + $0x14] ss:$8 sps:$4 sm:$0xff]  }
 0x127   :  { %1867 = vmatprep.subr.bf16.mxu0 %v3737_v62  ;;  %v3783_v62 = vld [vmem:[%s5531_s3 + $0x220] ss:$8 sps:$4 sm:$0xff]   ;;  %2196 = vmatprep.subr.bf16.mxu1 %v3878_v61 }
 0x129   :  { %2197 = vmatpush1.bf16.msra.mxu1 %v3876_v2 }
 0x12a   :  { %1868 = vmatpush1.bf16.msra.mxu0 %v3735_v4  ;;  %v3881_v4 = vld [vmem:[%s5533_s5 + $0x24] ss:$8 sps:$4 sm:$0xff]  }
 0x12b   :  { %1869 = vmatprep.subr.bf16.mxu0 %v3740_v6  ;;  %v3791_v6 = vld [vmem:[%s5531_s3 + $0x244] ss:$8 sps:$4 sm:$0xff]   ;;  %2198 = vmatprep.subr.bf16.mxu1 %v3881_v4 }
 0x12d   :  { %2199 = vmatpush1.bf16.msra.mxu1 %v3879_v7 }
 0x12e   :  { %1870 = vmatpush1.bf16.msra.mxu0 %v3738_v9  ;;  %v3789_v9 = vld [vmem:[%s5531_s3 + $0x240] ss:$8 sps:$4 sm:$0xff]   ;;  %2200 = vmatprep.subr.bf16.mxu1 %v3884_v8  ;;  %v3830_v8 = vld [vmem:[%s5531_s3 + $0x314] ss:$8 sps:$4 sm:$0xff]  }
 0x12f   :  { %1871 = vmatprep.subr.bf16.mxu0 %v3743_v19  ;;  %v3794_v19 = vld [vmem:[%s5531_s3 + $0x254] ss:$8 sps:$4 sm:$0xff]  }
 0x132   :  { %1872 = vmatpush1.bf16.msra.mxu0 %v3741_v10  ;;  %v3882_v10 = vld [vmem:[%s5533_s5 + $0x30] ss:$8 sps:$4 sm:$0xff]  }
 0x133   :  { %1873 = vmatprep.subr.bf16.mxu0 %v3746_v11  ;;  %v3887_v11 = vld [vmem:[%s5533_s5 + $0x44] ss:$8 sps:$4 sm:$0xff]   ;;  %2201 = vmatpush1.bf16.msra.mxu1 %v3882_v10  ;;  %v3831_v10 = vld [vmem:[%s5531_s3 + $0x320] ss:$8 sps:$4 sm:$0xff]  }
 0x134   :  { %2202 = vmatprep.subr.bf16.mxu1 %v3887_v11  ;;  %v3836_v11 = vld [vmem:[%s5531_s3 + $0x334] ss:$8 sps:$4 sm:$0xff]  }
 0x136   :  { %1874 = vmatpush1.bf16.msra.mxu0 %v3744_v12  ;;  %v3792_v12 = vld [vmem:[%s5531_s3 + $0x250] ss:$8 sps:$4 sm:$0xff]  }
 0x137   :  { %1875 = vmatprep.subr.bf16.mxu0 %v3749_v13  ;;  %v3797_v13 = vld [vmem:[%s5531_s3 + $0x264] ss:$8 sps:$4 sm:$0xff]  }
 0x13a   :  { %1876 = vmatpush1.bf16.msra.mxu0 %v3747_v14  ;;  %v3885_v14 = vld [vmem:[%s5533_s5 + $0x40] ss:$8 sps:$4 sm:$0xff]  }
 0x13b   :  { %1877 = vmatprep.subr.bf16.mxu0 %v3752_v15  ;;  %v3890_v15 = vld [vmem:[%s5533_s5 + $0x54] ss:$8 sps:$4 sm:$0xff]   ;;  %2203 = vmatpush1.bf16.msra.mxu1 %v3885_v14  ;;  %v3837_v14 = vld [vmem:[%s5531_s3 + $0x340] ss:$8 sps:$4 sm:$0xff]  }
 0x13c   :  { %2204 = vmatprep.subr.bf16.mxu1 %v3890_v15  ;;  %v3842_v15 = vld [vmem:[%s5531_s3 + $0x354] ss:$8 sps:$4 sm:$0xff]  }
 0x13e   :  { %1878 = vmatpush1.bf16.msra.mxu0 %v3750_v16  ;;  %v3795_v16 = vld [vmem:[%s5531_s3 + $0x260] ss:$8 sps:$4 sm:$0xff]  }
 0x13f   :  { %1879 = vmatprep.subr.bf16.mxu0 %v3755_v17  ;;  %v3888_v17 = vld [vmem:[%s5533_s5 + $0x50] ss:$8 sps:$4 sm:$0xff]  }
 0x140   :  { %2205 = vmatpush1.bf16.msra.mxu1 %v3888_v17  ;;  %v3845_v17 = vld [vmem:[%s5531_s3 + $0x364] ss:$8 sps:$4 sm:$0xff]  }
 0x142   :  { %1880 = vmatpush1.bf16.msra.mxu0 %v3753_v18  ;;  %v3800_v18 = vld [vmem:[%s5531_s3 + $0x274] ss:$8 sps:$4 sm:$0xff]  }
 0x143   :  { %1881 = vmatprep.subr.bf16.mxu0 %v3758_v3  ;;  %v3893_v3 = vld [vmem:[%s5533_s5 + $0x64] ss:$8 sps:$4 sm:$0xff]  }
 0x144   :  { %2206 = vmatprep.subr.bf16.mxu1 %v3893_v3  ;;  %v3848_v3 = vld [vmem:[%s5531_s3 + $0x374] ss:$8 sps:$4 sm:$0xff]  }
 0x146   :  { %1882 = vmatpush1.bf16.msra.mxu0 %v3756_v20  ;;  %v3798_v20 = vld [vmem:[%s5531_s3 + $0x270] ss:$8 sps:$4 sm:$0xff]  }
 0x147   :  { %1883 = vmatprep.subr.bf16.mxu0 %v3761_v21  ;;  %v3891_v21 = vld [vmem:[%s5533_s5 + $0x60] ss:$8 sps:$4 sm:$0xff]  }
 0x148   :  { %2207 = vmatpush1.bf16.msra.mxu1 %v3891_v21  ;;  %v3851_v21 = vld [vmem:[%s5531_s3 + $0x384] ss:$8 sps:$4 sm:$0xff]  }
 0x14a   :  { %1884 = vmatpush1.bf16.msra.mxu0 %v3759_v22  ;;  %v3803_v22 = vld [vmem:[%s5531_s3 + $0x284] ss:$8 sps:$4 sm:$0xff]  }
 0x14b   :  { %1885 = vmatprep.subr.bf16.mxu0 %v3764_v23  ;;  %v3896_v23 = vld [vmem:[%s5533_s5 + $0x74] ss:$8 sps:$4 sm:$0xff]  }
 0x14c   :  { %2208 = vmatprep.subr.bf16.mxu1 %v3896_v23  ;;  %v3854_v23 = vld [vmem:[%s5531_s3 + $0x394] ss:$8 sps:$4 sm:$0xff]  }
 0x14e   :  { %1886 = vmatpush1.bf16.msra.mxu0 %v3762_v24  ;;  %v3801_v24 = vld [vmem:[%s5531_s3 + $0x280] ss:$8 sps:$4 sm:$0xff]  }
 0x14f   :  { %1887 = vmatprep.subr.bf16.mxu0 %v3767_v25  ;;  %v3894_v25 = vld [vmem:[%s5533_s5 + $0x70] ss:$8 sps:$4 sm:$0xff]  }
 0x150   :  { %2209 = vmatpush1.bf16.msra.mxu1 %v3894_v25  ;;  %v3857_v25 = vld [vmem:[%s5531_s3 + $0x3a4] ss:$8 sps:$4 sm:$0xff]  }
 0x152   :  { %1888 = vmatpush1.bf16.msra.mxu0 %v3765_v27  ;;  %v3806_v27 = vld [vmem:[%s5531_s3 + $0x294] ss:$8 sps:$4 sm:$0xff]  }
 0x153   :  { %1889 = vmatprep.subr.bf16.mxu0 %v3770_v28  ;;  %v3899_v28 = vld [vmem:[%s5533_s5 + $0x84] ss:$8 sps:$4 sm:$0xff]  }
 0x154   :  { %2210 = vmatprep.subr.bf16.mxu1 %v3899_v28  ;;  %v3860_v28 = vld [vmem:[%s5531_s3 + $0x3b4] ss:$8 sps:$4 sm:$0xff]  }
 0x156   :  { %1890 = vmatpush1.bf16.msra.mxu0 %v3768_v30  ;;  %v3897_v30 = vld [vmem:[%s5533_s5 + $0x80] ss:$8 sps:$4 sm:$0xff]  }
 0x157   :  { %1891 = vmatprep.subr.bf16.mxu0 %v3773_v33  ;;  %v3902_v33 = vld [vmem:[%s5533_s5 + $0x94] ss:$8 sps:$4 sm:$0xff]   ;;  %2211 = vmatpush1.bf16.msra.mxu1 %v3897_v30  ;;  %v3863_v30 = vld [vmem:[%s5531_s3 + $0x3c4] ss:$8 sps:$4 sm:$0xff]  }
 0x158   :  { %v4802_v38 = vpop.f32.mrb[4].mxu0  ;;  %2212 = vmatprep.subr.bf16.mxu1 %v3902_v33  ;;  %v208_v33 = vsub.s32 6, %v4685_v42 }
 0x159   :  { %v980_v40 = vpop.f32.mrb[5].mxu0  ;;  %v4825_v58 = vpop.f32.mrb[4].mxu1 }
 0x15a   :  { %1892 = vmatpush1.bf16.msra.mxu0 %v3771_v35  ;;  %v981_v32 = vadd.f32 %v980_v40, %v205_v36  ;;  %v982_v46 = vpop.f32.mrb[6].mxu0  ;;  %v4830_v60 = vpop.f32.mrb[5].mxu1  ;;  %v3900_v35 = vld [vmem:[%s5533_s5 + $0x90] ss:$8 sps:$4 sm:$0xff]   ;;  %v3812_v36 = vld [vmem:[%s5531_s3 + $0x2b4] ss:$8 sps:$4 sm:$0xff]  }
 0x15b   :  { %1893 = vmatprep.subr.bf16.mxu0 %v3776_v37  ;;  %v983_v48 = vpop.f32.mrb[7].mxu0  ;;  %v1023_v0 = vpop.f32.mrb[6].mxu1  ;;  %v3905_v37 = vld [vmem:[%s5533_s5 + $0xa4] ss:$8 sps:$4 sm:$0xff]   ;;  %2213 = vmatpush1.bf16.msra.mxu1 %v3900_v35  ;;  %v3903_v40 = vld [vmem:[%s5533_s5 + $0xa0] ss:$8 sps:$4 sm:$0xff]  }
 0x15c   :  { %v1031_v49 = vmax.f32 %v981_v32, 0.0  ;;  %v1024_v1 = vpop.f32.mrb[7].mxu1  ;;  %2214 = vmatprep.subr.bf16.mxu1 %v3905_v37  ;;  %v3908_v32 = vld [vmem:[%s5533_s5 + $0xb4] ss:$8 sps:$4 sm:$0xff]   ;;  %v200_v46 = vsub.s32 4, %v4685_v42  ;;  %v212_v48 = vsub.s32 7, %v4685_v42 }
 0x15d   :  { %v3912_v0 = vld [vmem:[%s5533_s5 + $0xd0] ss:$8 sps:$4 sm:$0xff]   ;;  %v3824_v1 = vld [vmem:[%s5531_s3 + $0x2f4] ss:$8 sps:$4 sm:$0xff]   ;;  %v3869_v37 = vld [vmem:[%s5531_s3 + $0x3e4] ss:$8 sps:$4 sm:$0xff]  }
 0x15e   :  { %1894 = vmatpush1.bf16.msra.mxu0 %v3774_v41  ;;  %v1168_v52 = vpack.c.bf16 %v1031_v49, %v1031_v49  ;;  %v3815_v41 = vld [vmem:[%s5531_s3 + $0x2c4] ss:$8 sps:$4 sm:$0xff]   ;;  %v3906_v49 = vld [vmem:[%s5533_s5 + $0xb0] ss:$8 sps:$4 sm:$0xff]  }
 0x15f   :  { %1904 = vmatprep.subr.bf16.mxu0 %v3779_v47  ;;  %v3813_v47 = vld [vmem:[%s5531_s3 + $0x2c0] ss:$8 sps:$4 sm:$0xff]   ;;  %2215 = vmatpush1.bf16.msra.mxu1 %v3903_v40  ;;  %v3864_v35 = vld [vmem:[%s5531_s3 + $0x3d0] ss:$8 sps:$4 sm:$0xff]  }
 0x160   :  { %2216 = vmatprep.subr.bf16.mxu1 %v3908_v32  ;;  %v4110_v42 = vld [vmem:[%s5536_s9 + $0x1f0] ss:$8 sps:$4 sm:$0xff]  }
 0x161   :  { %1896 = vmatmul.mubr.bf16.vlgmr.msra.gmra.mrb[8].mxu0 %v1165_v50  ;;  %v3818_v50 = vld [vmem:[%s5531_s3 + $0x2d4] ss:$8 sps:$4 sm:$0xff]  }
 0x162   :  { %1905 = vmatpush1.bf16.msra.mxu0 %v3777_v51  ;;  %1936 = vmatprep.mubr.bf16.mxu0 %v1168_v52  ;;  %v3911_v51 = vld [vmem:[%s5533_s5 + $0xc4] ss:$8 sps:$4 sm:$0xff]   ;;  %v201_v52 = vrot.slane %v4693_v44, %v200_v46 }
 0x163   :  { %1906 = vmatprep.subr.bf16.mxu0 %v3782_v53  ;;  %v3816_v53 = vld [vmem:[%s5531_s3 + $0x2d0] ss:$8 sps:$4 sm:$0xff]   ;;  %2217 = vmatpush1.bf16.msra.mxu1 %v3906_v49 }
 0x164   :  { %2218 = vmatprep.subr.bf16.mxu1 %v3911_v51  ;;  %v979_v61 = vadd.f32 %v4802_v38, %v201_v52  ;;  %v3822_v38 = vld [vmem:[%s5531_s3 + $0x2f0] ss:$8 sps:$4 sm:$0xff]   ;;  %v1162_v51 = vld [vmem:[%s5535_s4] sm:$0x3] }
 0x165   :  { %v3918_v49 = vld [vmem:[%s5533_s5 + $0xf0] ss:$8 sps:$4 sm:$0xff]   ;;  %v1175_v52 = vrot.slane %v1162_v51, %v4688_v43 }
 0x166   :  { %1907 = vmatpush1.bf16.msra.mxu0 %v3780_v54  ;;  %v213_v54 = vrot.slane %v4693_v44, %v212_v48  ;;  %v1030_v2 = vmax.f32 %v979_v61, 0.0  ;;  %v3920_v48 = vld [vmem:[%s5533_s5 + $0xf4] ss:$8 sps:$4 sm:$0xff]  }
 0x167   :  { %1908 = vmatprep.subr.bf16.mxu0 %v3785_v56  ;;  %v3909_v56 = vld [vmem:[%s5533_s5 + $0xc0] ss:$8 sps:$4 sm:$0xff]  }
 0x168   :  { %2219 = vmatpush1.bf16.msra.mxu1 %v3909_v56 }
 0x169   :  { %2220 = vmatprep.subr.bf16.mxu1 %v3914_v59 }
 0x16a   :  { %1909 = vmatpush1.bf16.msra.mxu0 %v3783_v62  ;;  %v3819_v62 = vld [vmem:[%s5531_s3 + $0x2e0] ss:$8 sps:$4 sm:$0xff]  }
 0x16b   :  { %1910 = vmatprep.subr.bf16.mxu0 %v3788_v63  ;;  %v1022_v63 = vadd.f32 %v4830_v60, %v213_v54  ;;  %v3827_v60 = vld [vmem:[%s5531_s3 + $0x304] ss:$8 sps:$4 sm:$0xff]  }
 0x16c   :  { %2221 = vmatpush1.bf16.msra.mxu1 %v3912_v0 }
 0x16d   :  { %v1033_v4 = vmax.f32 %v1022_v63, 0.0 }
 0x16e   :  { %1911 = vmatpush1.bf16.msra.mxu0 %v3786_v5  ;;  %v1167_v5 = vpack.c.bf16 %v1030_v2, %v1030_v2  ;;  %v3921_v2 = vld [vmem:[%s5534_s7] ss:$16 sps:$4 sm:$0xff]  }
 0x16f   :  { %1912 = vmatprep.subr.bf16.mxu0 %v3791_v6  ;;  %v3825_v6 = vld [vmem:[%s5531_s3 + $0x300] ss:$8 sps:$4 sm:$0xff]   ;;  %v1170_v7 = vpack.c.bf16 %v1033_v4, %v1033_v4  ;;  %v3926_v4 = vld [vmem:[%s5534_s7 + $0x24] ss:$16 sps:$4 sm:$0xff]  }
 0x172   :  { %1913 = vmatpush1.bf16.msra.mxu0 %v3789_v9  ;;  %v3828_v9 = vld [vmem:[%s5531_s3 + $0x310] ss:$8 sps:$4 sm:$0xff]  }
 0x173   :  { %1914 = vmatprep.subr.bf16.mxu0 %v3794_v19  ;;  %v3833_v19 = vld [vmem:[%s5531_s3 + $0x324] ss:$8 sps:$4 sm:$0xff]  }
 0x176   :  { %1915 = vmatpush1.bf16.msra.mxu0 %v3792_v12  ;;  %v3834_v12 = vld [vmem:[%s5531_s3 + $0x330] ss:$8 sps:$4 sm:$0xff]  }
 0x177   :  { %1916 = vmatprep.subr.bf16.mxu0 %v3797_v13  ;;  %v3839_v13 = vld [vmem:[%s5531_s3 + $0x344] ss:$8 sps:$4 sm:$0xff]  }
 0x17a   :  { %1917 = vmatpush1.bf16.msra.mxu0 %v3795_v16  ;;  %v3840_v16 = vld [vmem:[%s5531_s3 + $0x350] ss:$8 sps:$4 sm:$0xff]  }
 0x17b   :  { %1918 = vmatprep.subr.bf16.mxu0 %v3800_v18  ;;  %v3843_v18 = vld [vmem:[%s5531_s3 + $0x360] ss:$8 sps:$4 sm:$0xff]  }
 0x17e   :  { %1919 = vmatpush1.bf16.msra.mxu0 %v3798_v20  ;;  %v3846_v20 = vld [vmem:[%s5531_s3 + $0x370] ss:$8 sps:$4 sm:$0xff]  }
 0x17f   :  { %1920 = vmatprep.subr.bf16.mxu0 %v3803_v22  ;;  %v3849_v22 = vld [vmem:[%s5531_s3 + $0x380] ss:$8 sps:$4 sm:$0xff]  }
 0x182   :  { %1921 = vmatpush1.bf16.msra.mxu0 %v3801_v24  ;;  %v3852_v24 = vld [vmem:[%s5531_s3 + $0x390] ss:$8 sps:$4 sm:$0xff]  }
 0x183   :  { %1922 = vmatprep.subr.bf16.mxu0 %v3806_v27  ;;  %v3855_v27 = vld [vmem:[%s5531_s3 + $0x3a0] ss:$8 sps:$4 sm:$0xff]  }
 0x186   :  { %1923 = vmatpush1.bf16.msra.mxu0 %v3804_v29  ;;  %v3858_v29 = vld [vmem:[%s5531_s3 + $0x3b0] ss:$8 sps:$4 sm:$0xff]  }
 0x187   :  { %1924 = vmatprep.subr.bf16.mxu0 %v3809_v31  ;;  %v3861_v31 = vld [vmem:[%s5531_s3 + $0x3c0] ss:$8 sps:$4 sm:$0xff]  }
 0x18a   :  { %1925 = vmatpush1.bf16.msra.mxu0 %v3807_v34  ;;  %v3866_v34 = vld [vmem:[%s5531_s3 + $0x3d4] ss:$8 sps:$4 sm:$0xff]  }
 0x18b   :  { %1926 = vmatprep.subr.bf16.mxu0 %v3812_v36  ;;  %v209_v36 = vrot.slane %v4693_v44, %v208_v33  ;;  %v3870_v44 = vld [vmem:[%s5531_s3 + $0x3f0] ss:$8 sps:$4 sm:$0xff]  }
 0x18c   :  { %v3966_v33 = vld [vmem:[%s5534_s7 + $0x1e0] ss:$16 sps:$4 sm:$0xff]  }
 0x18d   :  { %v1020_v40 = vadd.f32 %v4825_v58, %v209_v36  ;;  %v3915_v58 = vld [vmem:[%s5533_s5 + $0xe0] ss:$8 sps:$4 sm:$0xff]  }
 0x18e   :  { %1927 = vmatpush1.bf16.msra.mxu0 %v3810_v39  ;;  %v3867_v39 = vld [vmem:[%s5531_s3 + $0x3e0] ss:$8 sps:$4 sm:$0xff]  }
 0x18f   :  { %1928 = vmatprep.subr.bf16.mxu0 %v3815_v41  ;;  %v3872_v41 = vld [vmem:[%s5531_s3 + $0x3f4] ss:$8 sps:$4 sm:$0xff]   ;;  %v1032_v32 = vmax.f32 %v1020_v40, 0.0 }
 0x191   :  { %v1169_v46 = vpack.c.bf16 %v1032_v32, %v1032_v32 }
 0x192   :  { %1929 = vmatpush1.bf16.msra.mxu0 %v3813_v47  ;;  %v3917_v47 = vld [vmem:[%s5533_s5 + $0xe4] ss:$8 sps:$4 sm:$0xff]  }
 0x193   :  { %1930 = vmatprep.subr.bf16.mxu0 %v3818_v50  ;;  %2222 = vmatprep.subr.bf16.mxu1 %v3917_v47  ;;  %v3923_v50 = vld [vmem:[%s5534_s7 + $0x4] ss:$16 sps:$4 sm:$0xff]  }
 0x194   :  { %2223 = vmatpush1.bf16.msra.mxu1 %v3915_v58 }
 0x195   :  { %2224 = vmatprep.subr.bf16.mxu1 %v3920_v48 }
 0x196   :  { %1931 = vmatpush1.bf16.msra.mxu0 %v3816_v53  ;;  %v1179_v53 = vrot.slane %v1162_v51, %v4696_v45  ;;  %v3974_v51 = vld [vmem:[%s5534_s7 + $0x2c] ss:$16 sps:$4 sm:$0xff]  }
 0x197   :  { %1932 = vmatprep.subr.bf16.mxu0 %v3821_v57 }
 0x198   :  { %2225 = vmatpush1.bf16.msra.mxu1 %v3918_v49  ;;  %v3969_v49 = vld [vmem:[%s5534_s7 + $0x8] ss:$16 sps:$4 sm:$0xff]  }
 0x199   :  { %2645 = vmatprep.subr.bf16.mxu1 %v3923_v50 }
 0x19a   :  { %1933 = vmatpush1.bf16.msra.mxu0 %v3819_v62 }
 0x19b   :  { %1934 = vmatprep.subr.bf16.mxu0 %v3824_v1 }
 0x19e   :  { %1935 = vmatpush1.bf16.msra.mxu0 %v3822_v38 }
 0x19f   :  { %1945 = vmatprep.subr.bf16.mxu0 %v3827_v60  ;;  %v3924_v60 = vld [vmem:[%s5534_s7 + $0x20] ss:$16 sps:$4 sm:$0xff]  }
 0x1a1   :  { %1937 = vmatmul.mubr.bf16.vlgmr.msra.gmra.mrb[8].mxu0 %v1167_v5  ;;  %v3929_v5 = vld [vmem:[%s5534_s7 + $0x44] ss:$16 sps:$4 sm:$0xff]  }
 0x1a2   :  { %1946 = vmatpush1.bf16.msra.mxu0 %v3825_v6  ;;  %1977 = vmatprep.mubr.bf16.mxu0 %v1170_v7  ;;  %v3927_v6 = vld [vmem:[%s5534_s7 + $0x40] ss:$16 sps:$4 sm:$0xff]   ;;  %v3932_v7 = vld [vmem:[%s5534_s7 + $0x64] ss:$16 sps:$4 sm:$0xff]  }
 0x1a3   :  { %1947 = vmatprep.subr.bf16.mxu0 %v3830_v8  ;;  %v3930_v8 = vld [vmem:[%s5534_s7 + $0x60] ss:$16 sps:$4 sm:$0xff]  }
 0x1a6   :  { %1948 = vmatpush1.bf16.msra.mxu0 %v3828_v9  ;;  %v3935_v9 = vld [vmem:[%s5534_s7 + $0x84] ss:$16 sps:$4 sm:$0xff]  }
 0x1a7   :  { %1949 = vmatprep.subr.bf16.mxu0 %v3833_v19  ;;  %v3933_v19 = vld [vmem:[%s5534_s7 + $0x80] ss:$16 sps:$4 sm:$0xff]  }
 0x1aa   :  { %1950 = vmatpush1.bf16.msra.mxu0 %v3831_v10  ;;  %v3938_v10 = vld [vmem:[%s5534_s7 + $0xa4] ss:$16 sps:$4 sm:$0xff]  }
 0x1ab   :  { %1951 = vmatprep.subr.bf16.mxu0 %v3836_v11  ;;  %v3936_v11 = vld [vmem:[%s5534_s7 + $0xa0] ss:$16 sps:$4 sm:$0xff]  }
 0x1ae   :  { %1952 = vmatpush1.bf16.msra.mxu0 %v3834_v12  ;;  %v3941_v12 = vld [vmem:[%s5534_s7 + $0xc4] ss:$16 sps:$4 sm:$0xff]  }
 0x1af   :  { %1953 = vmatprep.subr.bf16.mxu0 %v3839_v13  ;;  %v3939_v13 = vld [vmem:[%s5534_s7 + $0xc0] ss:$16 sps:$4 sm:$0xff]  }
 0x1b2   :  { %1954 = vmatpush1.bf16.msra.mxu0 %v3837_v14  ;;  %v3944_v14 = vld [vmem:[%s5534_s7 + $0xe4] ss:$16 sps:$4 sm:$0xff]  }
 0x1b3   :  { %1955 = vmatprep.subr.bf16.mxu0 %v3842_v15  ;;  %v3942_v15 = vld [vmem:[%s5534_s7 + $0xe0] ss:$16 sps:$4 sm:$0xff]  }
 0x1b6   :  { %1956 = vmatpush1.bf16.msra.mxu0 %v3840_v16  ;;  %v3947_v16 = vld [vmem:[%s5534_s7 + $0x104] ss:$16 sps:$4 sm:$0xff]  }
 0x1b7   :  { %1957 = vmatprep.subr.bf16.mxu0 %v3845_v17  ;;  %v3945_v17 = vld [vmem:[%s5534_s7 + $0x100] ss:$16 sps:$4 sm:$0xff]  }
 0x1ba   :  { %1958 = vmatpush1.bf16.msra.mxu0 %v3843_v18  ;;  %v3950_v18 = vld [vmem:[%s5534_s7 + $0x124] ss:$16 sps:$4 sm:$0xff]  }
 0x1bb   :  { %1959 = vmatprep.subr.bf16.mxu0 %v3848_v3  ;;  %v3948_v3 = vld [vmem:[%s5534_s7 + $0x120] ss:$16 sps:$4 sm:$0xff]  }
 0x1be   :  { %1960 = vmatpush1.bf16.msra.mxu0 %v3846_v20  ;;  %v3953_v20 = vld [vmem:[%s5534_s7 + $0x144] ss:$16 sps:$4 sm:$0xff]  }
 0x1bf   :  { %1961 = vmatprep.subr.bf16.mxu0 %v3851_v21  ;;  %v3951_v21 = vld [vmem:[%s5534_s7 + $0x140] ss:$16 sps:$4 sm:$0xff]  }
 0x1c2   :  { %1962 = vmatpush1.bf16.msra.mxu0 %v3849_v22  ;;  %v3956_v22 = vld [vmem:[%s5534_s7 + $0x164] ss:$16 sps:$4 sm:$0xff]  }
 0x1c3   :  { %1963 = vmatprep.subr.bf16.mxu0 %v3854_v23  ;;  %v3954_v23 = vld [vmem:[%s5534_s7 + $0x160] ss:$16 sps:$4 sm:$0xff]  }
 0x1c6   :  { %1964 = vmatpush1.bf16.msra.mxu0 %v3852_v24  ;;  %v3959_v24 = vld [vmem:[%s5534_s7 + $0x184] ss:$16 sps:$4 sm:$0xff]  }
 0x1c7   :  { %1965 = vmatprep.subr.bf16.mxu0 %v3857_v25  ;;  %v3957_v25 = vld [vmem:[%s5534_s7 + $0x180] ss:$16 sps:$4 sm:$0xff]  }
 0x1ca   :  { %1966 = vmatpush1.bf16.msra.mxu0 %v3855_v27  ;;  %v3962_v27 = vld [vmem:[%s5534_s7 + $0x1a4] ss:$16 sps:$4 sm:$0xff]  }
 0x1cb   :  { %1967 = vmatprep.subr.bf16.mxu0 %v3860_v28  ;;  %v3960_v28 = vld [vmem:[%s5534_s7 + $0x1a0] ss:$16 sps:$4 sm:$0xff]  }
 0x1ce   :  { %1968 = vmatpush1.bf16.msra.mxu0 %v3858_v29  ;;  %v3965_v29 = vld [vmem:[%s5534_s7 + $0x1c4] ss:$16 sps:$4 sm:$0xff]  }
 0x1cf   :  { %1969 = vmatprep.subr.bf16.mxu0 %v3863_v30  ;;  %v3963_v30 = vld [vmem:[%s5534_s7 + $0x1c0] ss:$16 sps:$4 sm:$0xff]  }
 0x1d2   :  { %1970 = vmatpush1.bf16.msra.mxu0 %v3861_v31  ;;  %v3968_v31 = vld [vmem:[%s5534_s7 + $0x1e4] ss:$16 sps:$4 sm:$0xff]  }
 0x1d3   :  { %1971 = vmatprep.subr.bf16.mxu0 %v3866_v34  ;;  %v3971_v34 = vld [vmem:[%s5534_s7 + $0xc] ss:$16 sps:$4 sm:$0xff]  }
 0x1d6   :  { %1972 = vmatpush1.bf16.msra.mxu0 %v3864_v35  ;;  %v2020_v35 = vld [vmem:[%s5537_s6] sm:$0x3] }
 0x1d7   :  { %1973 = vmatprep.subr.bf16.mxu0 %v3869_v37  ;;  %v2027_v36 = vrot.slane %v2020_v35, %v4688_v43  ;;  %v2031_v37 = vrot.slane %v2020_v35, %v4696_v45  ;;  %v4038_v35 = vld [vmem:[%s5536_s9 + $0x70] ss:$8 sps:$4 sm:$0xff]  }
 0x1da   :  { %1974 = vmatpush1.bf16.msra.mxu0 %v3867_v39 }
 0x1db   :  { %1975 = vmatprep.subr.bf16.mxu0 %v3872_v41 }
 0x1de   :  { %1976 = vmatpush1.bf16.msra.mxu0 %v3870_v44 }
 0x1e1   :  { %1978 = vmatmul.mubr.bf16.vlgmr.msra.gmra.mrb[8].mxu0 %v1169_v46 }
 0x2b4   :  { %v1979_v54 = vpop.f32.mrb[8].mxu0 }
 0x2b5   :  { %v3661_v56 = vadd.f32 %v1979_v54, %v1175_v52  ;;  %v1981_v57 = vpop.f32.mrb[9].mxu0  ;;  %v3972_v52 = vld [vmem:[%s5534_s7 + $0x28] ss:$16 sps:$4 sm:$0xff]  }
 0x2b6   :  { %v3662_v59 = vadd.f32 %v1981_v57, %v1179_v53  ;;  %v1983_v61 = vpop.f32.mrb[10].mxu0  ;;  %v3977_v53 = vld [vmem:[%s5534_s7 + $0x4c] ss:$16 sps:$4 sm:$0xff]   ;;  %v3975_v54 = vld [vmem:[%s5534_s7 + $0x48] ss:$16 sps:$4 sm:$0xff]  }
 0x2b7   :  { %v1986_v62 = vmax.f32 %v3661_v56, 0.0  ;;  %v1984_v63 = vpop.f32.mrb[11].mxu0  ;;  %v3980_v56 = vld [vmem:[%s5534_s7 + $0x6c] ss:$16 sps:$4 sm:$0xff]   ;;  %v3978_v57 = vld [vmem:[%s5534_s7 + $0x68] ss:$16 sps:$4 sm:$0xff]  }
 0x2b8   :  { %v1987_v0 = vmax.f32 %v3662_v59, 0.0  ;;  %v3983_v59 = vld [vmem:[%s5534_s7 + $0x8c] ss:$16 sps:$4 sm:$0xff]   ;;  %v3981_v61 = vld [vmem:[%s5534_s7 + $0x88] ss:$16 sps:$4 sm:$0xff]  }
 0x2b9   :  { %v2021_v38 = vpack.c.bf16 %v1986_v62, %v1986_v62  ;;  %v3986_v62 = vld [vmem:[%s5534_s7 + $0xac] ss:$16 sps:$4 sm:$0xff]   ;;  %v3984_v63 = vld [vmem:[%s5534_s7 + $0xa8] ss:$16 sps:$4 sm:$0xff]  }
 0x2ba   :  { %v2022_v1 = vpack.c.bf16 %v1987_v0, %v1987_v0  ;;  %v3989_v0 = vld [vmem:[%s5534_s7 + $0xcc] ss:$16 sps:$4 sm:$0xff]  }
 0x2bc   :  { %2226 = vmatprep.mubr.bf16.mxu1 %v2022_v1  ;;  %v3987_v1 = vld [vmem:[%s5534_s7 + $0xc8] ss:$16 sps:$4 sm:$0xff]  }
 0x2bd   :  { %2227 = vmatmul.mubr.bf16.vlgmr.msra.gmra.mrb[8].mxu1 %v2021_v38  ;;  %v3990_v38 = vld [vmem:[%s5534_s7 + $0xe8] ss:$16 sps:$4 sm:$0xff]  }
 0x2be   :  { %2646 = vmatpush1.bf16.msra.mxu1 %v3921_v2  ;;  %v3992_v2 = vld [vmem:[%s5534_s7 + $0xec] ss:$16 sps:$4 sm:$0xff]  }
 0x2bf   :  { %2647 = vmatprep.subr.bf16.mxu1 %v3926_v4  ;;  %v3995_v4 = vld [vmem:[%s5534_s7 + $0x10c] ss:$16 sps:$4 sm:$0xff]  }
 0x2c2   :  { %2648 = vmatpush1.bf16.msra.mxu1 %v3924_v60  ;;  %v3993_v60 = vld [vmem:[%s5534_s7 + $0x108] ss:$16 sps:$4 sm:$0xff]  }
 0x2c3   :  { %2649 = vmatprep.subr.bf16.mxu1 %v3929_v5  ;;  %v3998_v5 = vld [vmem:[%s5534_s7 + $0x12c] ss:$16 sps:$4 sm:$0xff]  }
 0x2c6   :  { %2650 = vmatpush1.bf16.msra.mxu1 %v3927_v6  ;;  %v3996_v6 = vld [vmem:[%s5534_s7 + $0x128] ss:$16 sps:$4 sm:$0xff]  }
 0x2c7   :  { %2651 = vmatprep.subr.bf16.mxu1 %v3932_v7  ;;  %v4001_v7 = vld [vmem:[%s5534_s7 + $0x14c] ss:$16 sps:$4 sm:$0xff]  }
 0x2ca   :  { %2652 = vmatpush1.bf16.msra.mxu1 %v3930_v8  ;;  %v3999_v8 = vld [vmem:[%s5534_s7 + $0x148] ss:$16 sps:$4 sm:$0xff]  }
 0x2cb   :  { %2653 = vmatprep.subr.bf16.mxu1 %v3935_v9  ;;  %v4004_v9 = vld [vmem:[%s5534_s7 + $0x16c] ss:$16 sps:$4 sm:$0xff]  }
 0x2ce   :  { %2654 = vmatpush1.bf16.msra.mxu1 %v3933_v19  ;;  %v4002_v19 = vld [vmem:[%s5534_s7 + $0x168] ss:$16 sps:$4 sm:$0xff]  }
 0x2cf   :  { %2655 = vmatprep.subr.bf16.mxu1 %v3938_v10  ;;  %v4007_v10 = vld [vmem:[%s5534_s7 + $0x18c] ss:$16 sps:$4 sm:$0xff]  }
 0x2d2   :  { %2656 = vmatpush1.bf16.msra.mxu1 %v3936_v11  ;;  %v4005_v11 = vld [vmem:[%s5534_s7 + $0x188] ss:$16 sps:$4 sm:$0xff]  }
 0x2d3   :  { %2657 = vmatprep.subr.bf16.mxu1 %v3941_v12  ;;  %v4010_v12 = vld [vmem:[%s5534_s7 + $0x1ac] ss:$16 sps:$4 sm:$0xff]  }
 0x2d6   :  { %2658 = vmatpush1.bf16.msra.mxu1 %v3939_v13  ;;  %v4008_v13 = vld [vmem:[%s5534_s7 + $0x1a8] ss:$16 sps:$4 sm:$0xff]  }
 0x2d7   :  { %2659 = vmatprep.subr.bf16.mxu1 %v3944_v14  ;;  %v4013_v14 = vld [vmem:[%s5534_s7 + $0x1cc] ss:$16 sps:$4 sm:$0xff]  }
 0x2da   :  { %2660 = vmatpush1.bf16.msra.mxu1 %v3942_v15  ;;  %v4011_v15 = vld [vmem:[%s5534_s7 + $0x1c8] ss:$16 sps:$4 sm:$0xff]  }
 0x2db   :  { %2661 = vmatprep.subr.bf16.mxu1 %v3947_v16  ;;  %v4016_v16 = vld [vmem:[%s5534_s7 + $0x1ec] ss:$16 sps:$4 sm:$0xff]  }
 0x2de   :  { %2662 = vmatpush1.bf16.msra.mxu1 %v3945_v17  ;;  %v4014_v17 = vld [vmem:[%s5534_s7 + $0x1e8] ss:$16 sps:$4 sm:$0xff]  }
 0x2df   :  { %2663 = vmatprep.subr.bf16.mxu1 %v3950_v18  ;;  %v4019_v18 = vld [vmem:[%s5536_s9 + $0x4] ss:$8 sps:$4 sm:$0xff]  }
 0x2e2   :  { %2664 = vmatpush1.bf16.msra.mxu1 %v3948_v3  ;;  %v4017_v3 = vld [vmem:[%s5536_s9] ss:$8 sps:$4 sm:$0xff]  }
 0x2e3   :  { %2665 = vmatprep.subr.bf16.mxu1 %v3953_v20  ;;  %v4022_v20 = vld [vmem:[%s5536_s9 + $0x14] ss:$8 sps:$4 sm:$0xff]  }
 0x2e6   :  { %2666 = vmatpush1.bf16.msra.mxu1 %v3951_v21  ;;  %v4020_v21 = vld [vmem:[%s5536_s9 + $0x10] ss:$8 sps:$4 sm:$0xff]  }
 0x2e7   :  { %2667 = vmatprep.subr.bf16.mxu1 %v3956_v22  ;;  %v4025_v22 = vld [vmem:[%s5536_s9 + $0x24] ss:$8 sps:$4 sm:$0xff]  }
 0x2ea   :  { %2668 = vmatpush1.bf16.msra.mxu1 %v3954_v23  ;;  %v4023_v23 = vld [vmem:[%s5536_s9 + $0x20] ss:$8 sps:$4 sm:$0xff]  }
 0x2eb   :  { %2669 = vmatprep.subr.bf16.mxu1 %v3959_v24  ;;  %v4028_v24 = vld [vmem:[%s5536_s9 + $0x34] ss:$8 sps:$4 sm:$0xff]  }
 0x2ee   :  { %2670 = vmatpush1.bf16.msra.mxu1 %v3957_v25  ;;  %v4026_v25 = vld [vmem:[%s5536_s9 + $0x30] ss:$8 sps:$4 sm:$0xff]  }
 0x2ef   :  { %2671 = vmatprep.subr.bf16.mxu1 %v3962_v27  ;;  %v4031_v27 = vld [vmem:[%s5536_s9 + $0x44] ss:$8 sps:$4 sm:$0xff]  }
 0x2f2   :  { %2672 = vmatpush1.bf16.msra.mxu1 %v3960_v28  ;;  %v4029_v28 = vld [vmem:[%s5536_s9 + $0x40] ss:$8 sps:$4 sm:$0xff]  }
 0x2f3   :  { %2673 = vmatprep.subr.bf16.mxu1 %v3965_v29  ;;  %v4034_v29 = vld [vmem:[%s5536_s9 + $0x54] ss:$8 sps:$4 sm:$0xff]  }
 0x2f6   :  { %2674 = vmatpush1.bf16.msra.mxu1 %v3963_v30  ;;  %v4032_v30 = vld [vmem:[%s5536_s9 + $0x50] ss:$8 sps:$4 sm:$0xff]  }
 0x2f7   :  { %2675 = vmatprep.subr.bf16.mxu1 %v3968_v31  ;;  %v4037_v31 = vld [vmem:[%s5536_s9 + $0x64] ss:$8 sps:$4 sm:$0xff]  }
 0x2fa   :  { %2676 = vmatpush1.bf16.msra.mxu1 %v3966_v33  ;;  %v4035_v33 = vld [vmem:[%s5536_s9 + $0x60] ss:$8 sps:$4 sm:$0xff]  }
 0x2fb   :  { %2686 = vmatprep.subr.bf16.mxu1 %v3971_v34  ;;  %v4040_v34 = vld [vmem:[%s5536_s9 + $0x74] ss:$8 sps:$4 sm:$0xff]  }
 0x390   :  { %v2228_v39 = vpop.f32.mrb[8].mxu1 }
 0x391   :  { %v2229_v40 = vadd.f32 %v2228_v39, %v2027_v36  ;;  %v2230_v41 = vpop.f32.mrb[9].mxu1  ;;  %v4043_v36 = vld [vmem:[%s5536_s9 + $0x84] ss:$8 sps:$4 sm:$0xff]   ;;  %v4046_v39 = vld [vmem:[%s5536_s9 + $0x94] ss:$8 sps:$4 sm:$0xff]  }
 0x392   :  { %v2231_v44 = vadd.f32 %v2230_v41, %v2031_v37  ;;  %v2232_v32 = vpop.f32.mrb[10].mxu1  ;;  %v4041_v37 = vld [vmem:[%s5536_s9 + $0x80] ss:$8 sps:$4 sm:$0xff]   ;;  %v4049_v41 = vld [vmem:[%s5536_s9 + $0xa4] ss:$8 sps:$4 sm:$0xff]  }
 0x393   :  { %v2235_v46 = vmax.f32 %v2229_v40, 0.0  ;;  %v2233_v47 = vpop.f32.mrb[11].mxu1  ;;  %v4044_v40 = vld [vmem:[%s5536_s9 + $0x90] ss:$8 sps:$4 sm:$0xff]   ;;  %v4052_v32 = vld [vmem:[%s5536_s9 + $0xb4] ss:$8 sps:$4 sm:$0xff]  }
 0x394   :  { %v2236_v58 = vmax.f32 %v2231_v44, 0.0  ;;  %v4047_v44 = vld [vmem:[%s5536_s9 + $0xa0] ss:$8 sps:$4 sm:$0xff]   ;;  %v4055_v47 = vld [vmem:[%s5536_s9 + $0xc4] ss:$8 sps:$4 sm:$0xff]  }
 0x395   :  { %v5220_v50 = vpack.c.bf16 %v2235_v46, %v2235_v46  ;;  %v4050_v46 = vld [vmem:[%s5536_s9 + $0xb0] ss:$8 sps:$4 sm:$0xff]  }
 0x396   :  { %v2303_v48 = vpack.c.bf16 %v2236_v58, %v2236_v58  ;;  %v4053_v58 = vld [vmem:[%s5536_s9 + $0xc0] ss:$8 sps:$4 sm:$0xff]  }
 0x398   :  { %2677 = vmatprep.mubr.bf16.mxu1 %v2303_v48 }
 0x399   :  { %2678 = vmatmul.mubr.bf16.vlgmr.msra.gmra.mrb[12].mxu1 %v5220_v50 }
 0x39a   :  { %2687 = vmatpush1.bf16.msra.mxu1 %v3969_v49  ;;  %2718 = vmatprep.mubr.bf16.mxu1 %v2303_v48  ;;  %v4058_v48 = vld [vmem:[%s5536_s9 + $0xd4] ss:$8 sps:$4 sm:$0xff]   ;;  %v4056_v49 = vld [vmem:[%s5536_s9 + $0xd0] ss:$8 sps:$4 sm:$0xff]  }
 0x39b   :  { %2688 = vmatprep.subr.bf16.mxu1 %v3974_v51  ;;  %v4059_v51 = vld [vmem:[%s5536_s9 + $0xe0] ss:$8 sps:$4 sm:$0xff]  }
 0x39e   :  { %2689 = vmatpush1.bf16.msra.mxu1 %v3972_v52  ;;  %v4064_v52 = vld [vmem:[%s5536_s9 + $0xf4] ss:$8 sps:$4 sm:$0xff]  }
 0x39f   :  { %2690 = vmatprep.subr.bf16.mxu1 %v3977_v53  ;;  %v4062_v53 = vld [vmem:[%s5536_s9 + $0xf0] ss:$8 sps:$4 sm:$0xff]  }
 0x3a2   :  { %2691 = vmatpush1.bf16.msra.mxu1 %v3975_v54  ;;  %v4067_v54 = vld [vmem:[%s5536_s9 + $0x104] ss:$8 sps:$4 sm:$0xff]  }
 0x3a3   :  { %2692 = vmatprep.subr.bf16.mxu1 %v3980_v56  ;;  %v5416_v56 = vld [vmem:[%s5538_s8] sm:$0xf] }
 0x3a6   :  { %2693 = vmatpush1.bf16.msra.mxu1 %v3978_v57  ;;  %v2308_v57 = vrot.slane %v5416_v56, %v4688_v43 }
 0x3a7   :  { %2694 = vmatprep.subr.bf16.mxu1 %v3983_v59  ;;  %v2312_v59 = vrot.slane %v5416_v56, %v4696_v45 }
 0x3aa   :  { %2695 = vmatpush1.bf16.msra.mxu1 %v3981_v61 }
 0x3ab   :  { %2696 = vmatprep.subr.bf16.mxu1 %v3986_v62 }
 0x3ae   :  { %2697 = vmatpush1.bf16.msra.mxu1 %v3984_v63 }
 0x3af   :  { %2698 = vmatprep.subr.bf16.mxu1 %v3989_v0 }
 0x3b2   :  { %2699 = vmatpush1.bf16.msra.mxu1 %v3987_v1 }
 0x3b3   :  { %2700 = vmatprep.subr.bf16.mxu1 %v3992_v2 }
 0x3b6   :  { %2701 = vmatpush1.bf16.msra.mxu1 %v3990_v38 }
 0x3b7   :  { %2702 = vmatprep.subr.bf16.mxu1 %v3995_v4 }
 0x3ba   :  { %2703 = vmatpush1.bf16.msra.mxu1 %v3993_v60 }
 0x3bb   :  { %2704 = vmatprep.subr.bf16.mxu1 %v3998_v5  ;;  %v4065_v5 = vld [vmem:[%s5536_s9 + $0x100] ss:$8 sps:$4 sm:$0xff]  }
 0x3be   :  { %2705 = vmatpush1.bf16.msra.mxu1 %v3996_v6 }
 0x3bf   :  { %2706 = vmatprep.subr.bf16.mxu1 %v4001_v7  ;;  %v4070_v7 = vld [vmem:[%s5536_s9 + $0x114] ss:$8 sps:$4 sm:$0xff]  }
 0x3c2   :  { %2707 = vmatpush1.bf16.msra.mxu1 %v3999_v8  ;;  %v4068_v8 = vld [vmem:[%s5536_s9 + $0x110] ss:$8 sps:$4 sm:$0xff]  }
 0x3c3   :  { %2708 = vmatprep.subr.bf16.mxu1 %v4004_v9  ;;  %v4073_v9 = vld [vmem:[%s5536_s9 + $0x124] ss:$8 sps:$4 sm:$0xff]  }
 0x3c6   :  { %2709 = vmatpush1.bf16.msra.mxu1 %v4002_v19  ;;  %v4071_v19 = vld [vmem:[%s5536_s9 + $0x120] ss:$8 sps:$4 sm:$0xff]  }
 0x3c7   :  { %2710 = vmatprep.subr.bf16.mxu1 %v4007_v10  ;;  %v4076_v10 = vld [vmem:[%s5536_s9 + $0x134] ss:$8 sps:$4 sm:$0xff]  }
 0x3ca   :  { %2711 = vmatpush1.bf16.msra.mxu1 %v4005_v11  ;;  %v4074_v11 = vld [vmem:[%s5536_s9 + $0x130] ss:$8 sps:$4 sm:$0xff]  }
 0x3cb   :  { %2712 = vmatprep.subr.bf16.mxu1 %v4010_v12  ;;  %v4079_v12 = vld [vmem:[%s5536_s9 + $0x144] ss:$8 sps:$4 sm:$0xff]  }
 0x3ce   :  { %2713 = vmatpush1.bf16.msra.mxu1 %v4008_v13  ;;  %v4077_v13 = vld [vmem:[%s5536_s9 + $0x140] ss:$8 sps:$4 sm:$0xff]  }
 0x3cf   :  { %2714 = vmatprep.subr.bf16.mxu1 %v4013_v14  ;;  %v4082_v14 = vld [vmem:[%s5536_s9 + $0x154] ss:$8 sps:$4 sm:$0xff]  }
 0x3d2   :  { %2715 = vmatpush1.bf16.msra.mxu1 %v4011_v15  ;;  %v4080_v15 = vld [vmem:[%s5536_s9 + $0x150] ss:$8 sps:$4 sm:$0xff]  }
 0x3d3   :  { %2716 = vmatprep.subr.bf16.mxu1 %v4016_v16  ;;  %v4085_v16 = vld [vmem:[%s5536_s9 + $0x164] ss:$8 sps:$4 sm:$0xff]  }
 0x3d6   :  { %2717 = vmatpush1.bf16.msra.mxu1 %v4014_v17  ;;  %v4083_v17 = vld [vmem:[%s5536_s9 + $0x160] ss:$8 sps:$4 sm:$0xff]  }
 0x3d7   :  { %3131 = vmatprep.subr.bf16.mxu1 %v4019_v18  ;;  %v4088_v18 = vld [vmem:[%s5536_s9 + $0x174] ss:$8 sps:$4 sm:$0xff]  }
 0x3d9   :  { %2719 = vmatmul.mubr.bf16.vlgmr.msra.gmra.mrb[16].mxu1 %v5220_v50  ;;  %v4061_v50 = vld [vmem:[%s5536_s9 + $0xe4] ss:$8 sps:$4 sm:$0xff]  }
 0x3da   :  { %3132 = vmatpush1.bf16.msra.mxu1 %v4017_v3  ;;  %v4086_v3 = vld [vmem:[%s5536_s9 + $0x170] ss:$8 sps:$4 sm:$0xff]  }
 0x3db   :  { %3133 = vmatprep.subr.bf16.mxu1 %v4022_v20  ;;  %v4091_v20 = vld [vmem:[%s5536_s9 + $0x184] ss:$8 sps:$4 sm:$0xff]  }
 0x3de   :  { %3134 = vmatpush1.bf16.msra.mxu1 %v4020_v21  ;;  %v4089_v21 = vld [vmem:[%s5536_s9 + $0x180] ss:$8 sps:$4 sm:$0xff]  }
 0x3df   :  { %3135 = vmatprep.subr.bf16.mxu1 %v4025_v22  ;;  %v4094_v22 = vld [vmem:[%s5536_s9 + $0x194] ss:$8 sps:$4 sm:$0xff]  }
 0x3e2   :  { %3136 = vmatpush1.bf16.msra.mxu1 %v4023_v23  ;;  %v4092_v23 = vld [vmem:[%s5536_s9 + $0x190] ss:$8 sps:$4 sm:$0xff]  }
 0x3e3   :  { %3137 = vmatprep.subr.bf16.mxu1 %v4028_v24  ;;  %v4097_v24 = vld [vmem:[%s5536_s9 + $0x1a4] ss:$8 sps:$4 sm:$0xff]  }
 0x3e6   :  { %3138 = vmatpush1.bf16.msra.mxu1 %v4026_v25  ;;  %v4095_v25 = vld [vmem:[%s5536_s9 + $0x1a0] ss:$8 sps:$4 sm:$0xff]  }
 0x3e7   :  { %3139 = vmatprep.subr.bf16.mxu1 %v4031_v27  ;;  %v4100_v27 = vld [vmem:[%s5536_s9 + $0x1b4] ss:$8 sps:$4 sm:$0xff]  }
 0x3ea   :  { %3140 = vmatpush1.bf16.msra.mxu1 %v4029_v28  ;;  %v4098_v28 = vld [vmem:[%s5536_s9 + $0x1b0] ss:$8 sps:$4 sm:$0xff]  }
 0x3eb   :  { %3141 = vmatprep.subr.bf16.mxu1 %v4034_v29  ;;  %v4103_v29 = vld [vmem:[%s5536_s9 + $0x1c4] ss:$8 sps:$4 sm:$0xff]  }
 0x3ee   :  { %3142 = vmatpush1.bf16.msra.mxu1 %v4032_v30  ;;  %v4101_v30 = vld [vmem:[%s5536_s9 + $0x1c0] ss:$8 sps:$4 sm:$0xff]  }
 0x3ef   :  { %3143 = vmatprep.subr.bf16.mxu1 %v4037_v31  ;;  %v4106_v31 = vld [vmem:[%s5536_s9 + $0x1d4] ss:$8 sps:$4 sm:$0xff]  }
 0x3f2   :  { %3144 = vmatpush1.bf16.msra.mxu1 %v4035_v33  ;;  %v4104_v33 = vld [vmem:[%s5536_s9 + $0x1d0] ss:$8 sps:$4 sm:$0xff]  }
 0x3f3   :  { %3145 = vmatprep.subr.bf16.mxu1 %v4040_v34  ;;  %v4109_v34 = vld [vmem:[%s5536_s9 + $0x1e4] ss:$8 sps:$4 sm:$0xff]  }
 0x3f6   :  { %3146 = vmatpush1.bf16.msra.mxu1 %v4038_v35  ;;  %v2316_v35 = vrot.slane %v5416_v56, %v192_v26 }
 0x3f7   :  { %3147 = vmatprep.subr.bf16.mxu1 %v4043_v36  ;;  %v2320_v36 = vrot.slane %v5416_v56, %v196_v55 }
 0x3fa   :  { %3148 = vmatpush1.bf16.msra.mxu1 %v4041_v37  ;;  %v4107_v37 = vld [vmem:[%s5536_s9 + $0x1e0] ss:$8 sps:$4 sm:$0xff]  }
 0x3fb   :  { %3149 = vmatprep.subr.bf16.mxu1 %v4046_v39  ;;  %v4112_v39 = vld [vmem:[%s5536_s9 + $0x1f4] ss:$8 sps:$4 sm:$0xff]  }
 0x3fe   :  { %3150 = vmatpush1.bf16.msra.mxu1 %v4044_v40 }
 0x3ff   :  { %3151 = vmatprep.subr.bf16.mxu1 %v4049_v41 }
 0x402   :  { %3152 = vmatpush1.bf16.msra.mxu1 %v4047_v44 }
 0x403   :  { %3153 = vmatprep.subr.bf16.mxu1 %v4052_v32 }
 0x406   :  { %3154 = vmatpush1.bf16.msra.mxu1 %v4050_v46 }
 0x407   :  { %3155 = vmatprep.subr.bf16.mxu1 %v4055_v47 }
 0x40a   :  { %3156 = vmatpush1.bf16.msra.mxu1 %v4053_v58 }
 0x40b   :  { %3157 = vmatprep.subr.bf16.mxu1 %v4058_v48 }
 0x40e   :  { %3158 = vmatpush1.bf16.msra.mxu1 %v4056_v49  ;;  %v2795_v49 = vld [vmem:[%s5539_s10] sm:$0x3] }
 0x40f   :  { %3159 = vmatprep.subr.bf16.mxu1 %v4061_v50  ;;  %v2804_v50 = vrot.slane %v2795_v49, %v4688_v43 }
 0x412   :  { %3160 = vmatpush1.bf16.msra.mxu1 %v4059_v51  ;;  %v2808_v51 = vrot.slane %v2795_v49, %v4696_v45 }
 0x413   :  { %3161 = vmatprep.subr.bf16.mxu1 %v4064_v52 }
 0x416   :  { %3162 = vmatpush1.bf16.msra.mxu1 %v4062_v53 }
 0x417   :  { %3172 = vmatprep.subr.bf16.mxu1 %v4067_v54 }
 0x46c   :  { %v2679_v61 = vpop.f32.mrb[12].mxu1 }
 0x46d   :  { %v2680_v62 = vadd.f32 %v2679_v61, %v2308_v57  ;;  %v2681_v63 = vpop.f32.mrb[13].mxu1 }
 0x46e   :  { %v2682_v0 = vadd.f32 %v2681_v63, %v2312_v59  ;;  %v2683_v1 = vpop.f32.mrb[14].mxu1 }
 0x46f   :  { %v2727_v2 = vmax.f32 %v2680_v62, 0.0  ;;  %v2684_v38 = vpop.f32.mrb[15].mxu1 }
 0x470   :  { %v2728_v4 = vmax.f32 %v2682_v0, 0.0 }
 0x471   :  { %v2796_v6 = vpack.c.bf16 %v2727_v2, %v2727_v2 }
 0x472   :  { %v2797_v60 = vpack.c.bf16 %v2728_v4, %v2728_v4 }
 0x474   :  { %3163 = vmatprep.mubr.bf16.mxu1 %v2797_v60 }
 0x475   :  { %3164 = vmatmul.mubr.bf16.vlgmr.msra.gmra.mrb[20].mxu1 %v2796_v6 }
 0x476   :  { %3173 = vmatpush1.bf16.msra.mxu1 %v4065_v5 }
 0x477   :  { %3174 = vmatprep.subr.bf16.mxu1 %v4070_v7 }
 0x47a   :  { %3175 = vmatpush1.bf16.msra.mxu1 %v4068_v8 }
 0x47b   :  { %3176 = vmatprep.subr.bf16.mxu1 %v4073_v9 }
 0x47e   :  { %3177 = vmatpush1.bf16.msra.mxu1 %v4071_v19 }
 0x47f   :  { %3178 = vmatprep.subr.bf16.mxu1 %v4076_v10 }
 0x482   :  { %3179 = vmatpush1.bf16.msra.mxu1 %v4074_v11 }
 0x483   :  { %3180 = vmatprep.subr.bf16.mxu1 %v4079_v12 }
 0x486   :  { %3181 = vmatpush1.bf16.msra.mxu1 %v4077_v13 }
 0x487   :  { %3182 = vmatprep.subr.bf16.mxu1 %v4082_v14 }
 0x48a   :  { %3183 = vmatpush1.bf16.msra.mxu1 %v4080_v15 }
 0x48b   :  { %3184 = vmatprep.subr.bf16.mxu1 %v4085_v16 }
 0x48e   :  { %3185 = vmatpush1.bf16.msra.mxu1 %v4083_v17 }
 0x48f   :  { %3186 = vmatprep.subr.bf16.mxu1 %v4088_v18 }
 0x492   :  { %3187 = vmatpush1.bf16.msra.mxu1 %v4086_v3 }
 0x493   :  { %3188 = vmatprep.subr.bf16.mxu1 %v4091_v20 }
 0x496   :  { %3189 = vmatpush1.bf16.msra.mxu1 %v4089_v21 }
 0x497   :  { %3190 = vmatprep.subr.bf16.mxu1 %v4094_v22 }
 0x49a   :  { %3191 = vmatpush1.bf16.msra.mxu1 %v4092_v23 }
 0x49b   :  { %3192 = vmatprep.subr.bf16.mxu1 %v4097_v24 }
 0x49e   :  { %3193 = vmatpush1.bf16.msra.mxu1 %v4095_v25 }
 0x49f   :  { %3194 = vmatprep.subr.bf16.mxu1 %v4100_v27 }
 0x4a2   :  { %3195 = vmatpush1.bf16.msra.mxu1 %v4098_v28 }
 0x4a3   :  { %3196 = vmatprep.subr.bf16.mxu1 %v4103_v29 }
 0x4a6   :  { %3197 = vmatpush1.bf16.msra.mxu1 %v4101_v30 }
 0x4a7   :  { %3198 = vmatprep.subr.bf16.mxu1 %v4106_v31 }
 0x4aa   :  { %3199 = vmatpush1.bf16.msra.mxu1 %v4104_v33 }
 0x4ab   :  { %3200 = vmatprep.subr.bf16.mxu1 %v4109_v34 }
 0x4ac   :  { %v2720_v40 = vpop.f32.mrb[16].mxu1 }
 0x4ad   :  { %v2721_v41 = vadd.f32 %v2720_v40, %v2316_v35  ;;  %v2722_v44 = vpop.f32.mrb[17].mxu1 }
 0x4ae   :  { %v2723_v32 = vadd.f32 %v2722_v44, %v2320_v36  ;;  %v2724_v46 = vpop.f32.mrb[18].mxu1  ;;  %3201 = vmatpush1.bf16.msra.mxu1 %v4107_v37 }
 0x4af   :  { %v2729_v55 = vmax.f32 %v2721_v41, 0.0  ;;  %v2725_v26 = vpop.f32.mrb[19].mxu1  ;;  %3202 = vmatprep.subr.bf16.mxu1 %v4112_v39 }
 0x4b0   :  { %v2730_v47 = vmax.f32 %v2723_v32, 0.0 }
 0x4b1   :  { %v2798_v48 = vpack.c.bf16 %v2729_v55, %v2729_v55 }
 0x4b2   :  { %v2799_v58 = vpack.c.bf16 %v2730_v47, %v2730_v47  ;;  %3203 = vmatpush1.bf16.msra.mxu1 %v4110_v42 }
 0x4b4   :  { %3204 = vmatprep.mubr.bf16.mxu1 %v2799_v58 }
 0x4b5   :  { %3205 = vmatmul.mubr.bf16.vlgmr.msra.gmra.mrb[20].mxu1 %v2798_v48 }
 0x588   :  { %v3206_v52 = vpop.f32.mrb[20].mxu1 }
 0x589   :  { %v3663_v53 = vadd.f32 %v3206_v52, %v2804_v50  ;;  %v3208_v54 = vpop.f32.mrb[21].mxu1 }
 0x58a   :  { %v3664_v56 = vadd.f32 %v3208_v54, %v2808_v51  ;;  %v3210_v57 = vpop.f32.mrb[22].mxu1 }
 0x58b   :  { %v3658_v59 = vmul.f32 -1.442695, %v3663_v53  ;;  %v3211_v61 = vpop.f32.mrb[23].mxu1 }
 0x58c   :  { %v3659_v62 = vmul.f32 -1.442695, %v3664_v56 }
 0x58d   :  { %4113 = vpow2.f32 %v3658_v59 }
 0x58e   :  { %4115 = vpow2.f32 %v3659_v62 }
 0x597   :  { %v4114_v63 = vpop.eup %4113 }
 0x598   :  { %v4116_v0 = vpop.eup %4115  ;;  %v3219_v1 = vadd.f32 1.0, %v4114_v63 }
 0x599   :  { %v3220_v2 = vadd.f32 1.0, %v4116_v0 }
 0x59a   :  { %4117 = vrcp.f32 %v3219_v1 }
 0x59b   :  { %4119 = vrcp.f32 %v3220_v2 }
 0x5a4   :  { %v4118_v38 = vpop.eup %4117 }
 0x5a5   :  { %v4120_v43 = vpop.eup %4119 }
 0x5a6   :  { %v3227_v4 = vcombine.low %v4118_v38, %v4120_v43 }
 0x5a8   :  { %3660 = vst.sshfl [vmem:[%s5540_s11] sm:$0x33 pattern:$0x76325410] %v3227_v4 }

</bundles_post_ra>
